<compile_context>
chip_gen: v7x
topology: tpu7x:2x2x1
jax: 0.10.0
libtpu: 0.0.40
codegen_flags: <defaults>
</compile_context>

<pallas_src>
import functools

import jax
import jax.numpy as jnp
from jax.experimental import pallas as pl
from jax.experimental.pallas import tpu as pltpu


def _round_up(x, m):
    return ((x + m - 1) // m) * m


def _fused_cnn_kernel(ids_ref, emb_ref, w1_ref, b1_ref, w2_ref, b2_ref,
                      w3_ref, b3_ref, o_ref):
    """One batch tile. Everything downstream of the token ids stays in VMEM.

    ids_ref: (TB, L, 1)   int32  token ids (padded batch rows are 0)
    emb_ref: (Vp, E)      bf16   embedding table, vocab zero-padded to Vp
    w1_ref : (K1, E, C)   bf16   conv1 weight (tap-major, matches im2col)
    b1_ref : (1, C)       f32
    w2_ref : (K2, C, C)   bf16
    b2_ref : (1, C)       f32
    w3_ref : (C, NCP)     bf16   conv_out weight, classes zero-padded to NCP
    b3_ref : (1, NCP)     f32
    o_ref  : (TB, L, NCP) f32    narrow (NCP=8) logits block
    """
    TB, L, _ = ids_ref.shape
    Vp, E = emb_ref.shape
    K1, _, C = w1_ref.shape
    K2 = w2_ref.shape[0]
    NCP = w3_ref.shape[1]
    M = TB * L
    p1 = (K1 - 1) // 2
    p2 = (K2 - 1) // 2

    # ---- embedding lookup fused in-kernel: one-hot MXU matmul -------------
    # Exact row selection (padding_idx=0 row is all-zero in the table).
    ids = ids_ref[...]                                           # (TB, L, 1)
    iota_v = jax.lax.broadcasted_iota(jnp.int32, (TB, L, Vp), 2)
    onehot = (iota_v == ids).astype(jnp.bfloat16)                # (TB, L, Vp)
    x = jnp.dot(onehot.reshape(M, Vp), emb_ref[...],
                preferred_element_type=jnp.float32)              # (M, E)
    x = x.astype(jnp.bfloat16).reshape(TB, L, E)

    # ---- conv1 (K=5, 'same') via im2col: (M, K1*E) x (K1*E, C) ------------
    zpad1 = jnp.zeros((TB, p1, E), jnp.bfloat16)
    xp = jnp.concatenate([zpad1, x, zpad1], axis=1)              # halo in VMEM
    x_unf = jnp.concatenate([xp[:, k:k + L, :] for k in range(K1)], axis=-1)
    x_unf = x_unf.reshape(M, K1 * E)
    h = jnp.dot(x_unf, w1_ref[...].reshape(K1 * E, C),
                preferred_element_type=jnp.float32)
    h = jnp.maximum(h + b1_ref[0], 0.0)                          # bias+ReLU f32
    # dropout(p=0.3) -> identity (inference)

    # ---- conv2 (K=3, 'same') via im2col, activations stay in VMEM ---------
    hb = h.astype(jnp.bfloat16).reshape(TB, L, C)
    zpad2 = jnp.zeros((TB, p2, C), jnp.bfloat16)
    hp = jnp.concatenate([zpad2, hb, zpad2], axis=1)
    h_unf = jnp.concatenate([hp[:, k:k + L, :] for k in range(K2)], axis=-1)
    h_unf = h_unf.reshape(M, K2 * C)
    h2 = jnp.dot(h_unf, w2_ref[...].reshape(K2 * C, C),
                 preferred_element_type=jnp.float32)
    h2 = jnp.maximum(h2 + b2_ref[0], 0.0)
    # dropout(p=0.3) -> identity (inference)

    # ---- conv_out (K=1 pointwise), narrow NCP-wide output ------------------
    logits = jnp.dot(h2.astype(jnp.bfloat16), w3_ref[...],
                     preferred_element_type=jnp.float32) + b3_ref[0]
    # (M, NCP) -> (TB, L, NCP): leading-dim split only (L multiple of 8), free.
    o_ref[...] = logits.reshape(TB, L, NCP).astype(o_ref.dtype)


def prepare_params(params):
    """One-time weight prep (bf16 casts, padding) hoisted out of the forward."""
    emb = params["embedding"]
    V, E = emb.shape
    C = params["w1"].shape[-1]
    NC = params["w3"].shape[-1]
    Vp = _round_up(V, 128)           # contraction/lane-aligned one-hot width
    NCP = _round_up(NC, 8)           # narrow padded class dim (32 B/token out)
    if Vp > 4096:
        # TODO(synk): large-vocab fallback (XLA gather feeding the kernel).
        raise NotImplementedError(
            "in-kernel one-hot embedding lookup assumes a small vocabulary")
    embp = jnp.zeros((Vp, E), jnp.bfloat16).at[:V].set(emb.astype(jnp.bfloat16))
    w3 = params["w3"].reshape(C, NC).astype(jnp.bfloat16)
    w3p = jnp.zeros((C, NCP), jnp.bfloat16).at[:, :NC].set(w3)
    b3p = jnp.zeros((1, NCP), jnp.float32).at[0, :NC].set(
        params["b3"].astype(jnp.float32))
    return {
        "emb": embp,
        "w1": params["w1"].astype(jnp.bfloat16),
        "b1": params["b1"].reshape(1, C).astype(jnp.float32),
        "w2": params["w2"].astype(jnp.bfloat16),
        "b2": params["b2"].reshape(1, C).astype(jnp.float32),
        "w3": w3p,
        "b3": b3p,
    }


def cnn_classifier_forward(token_ids, prepped, *, num_classes, batch_tile=None):
    """token_ids (B, L) int32 -> logits (B, L, num_classes) f32."""
    B, L = token_ids.shape
    embp = prepped["emb"]
    Vp, E = embp.shape
    K1, _, C = prepped["w1"].shape
    K2 = prepped["w2"].shape[0]
    NCP = prepped["w3"].shape[1]

    # Batch tiling: fold TB samples into the matmul M dim (M = TB*L rows per
    # grid step, target ~2048). TB is kept a multiple of 8 (sublane-aligned
    # blocks) and, when the batch allows, the grid has >= 2 steps so v7x's two
    # TensorCores both get work via the "parallel" axis.
    if batch_tile is None:
        tb = max(8, (min(2048 // max(L, 1), 512) // 8) * 8)
        tb = min(tb, _round_up(B, 8))
        if B >= 16 and B < 2 * tb:
            tb = max(8, ((_round_up(B, 16) // 2) // 8) * 8)
        batch_tile = tb
    TB = batch_tile
    Bp = _round_up(B, TB)

    ids = token_ids.astype(jnp.int32)
    if Bp != B:
        ids = jnp.pad(ids, ((0, Bp - B), (0, 0)))   # pad ids=0 -> zero emb row
    ids = ids.reshape(Bp, L, 1)                      # lane-1 layout for kernel

    out = pl.pallas_call(
        _fused_cnn_kernel,
        out_shape=jax.ShapeDtypeStruct((Bp, L, NCP), jnp.float32),
        grid=(Bp // TB,),
        in_specs=[
            pl.BlockSpec((TB, L, 1), lambda i: (i, 0, 0)),   # token ids
            pl.BlockSpec((Vp, E), lambda i: (0, 0)),         # embedding table
            pl.BlockSpec((K1, E, C), lambda i: (0, 0, 0)),
            pl.BlockSpec((1, C), lambda i: (0, 0)),
            pl.BlockSpec((K2, C, C), lambda i: (0, 0, 0)),
            pl.BlockSpec((1, C), lambda i: (0, 0)),
            pl.BlockSpec((C, NCP), lambda i: (0, 0)),
            pl.BlockSpec((1, NCP), lambda i: (0, 0)),
        ],
        out_specs=pl.BlockSpec((TB, L, NCP), lambda i: (i, 0, 0)),
        compiler_params=pltpu.CompilerParams(
            dimension_semantics=("parallel",)),
    )(ids, embp, prepped["w1"], prepped["b1"], prepped["w2"], prepped["b2"],
      prepped["w3"], prepped["b3"])

    return out[:B, :, :num_classes]


def init_params(key, vocab_size, embedding_dim, num_classes):
    ks = jax.random.split(key, 7)
    emb = jax.random.normal(ks[0], (vocab_size, embedding_dim), jnp.float32) * 0.1
    emb = emb.at[0].set(0.0)                       # padding_idx=0 -> zero row
    def conv_w(k, K, cin, cout):
        scale = 1.0 / jnp.sqrt(jnp.float32(cin * K))
        return jax.random.uniform(k, (K, cin, cout), jnp.float32,
                                  minval=-scale, maxval=scale)
    return {
        "embedding": emb,
        "w1": conv_w(ks[1], 5, embedding_dim, 128),
        "b1": jax.random.normal(ks[2], (128,), jnp.float32) * 0.01,
        "w2": conv_w(ks[3], 3, 128, 128),
        "b2": jax.random.normal(ks[4], (128,), jnp.float32) * 0.01,
        "w3": conv_w(ks[5], 1, 128, 5),            # NUM_CLASSES = 1 + 4 categories
        "b3": jax.random.normal(ks[6], (5,), jnp.float32) * 0.01,
    }


def _reference_forward(token_ids, params):
    """Pure-JAX reference using the same bf16-input / f32-accumulate math."""
    def conv_ref(x, w, b, K, pad):
        L = x.shape[1]
        xp = jnp.pad(x.astype(jnp.bfloat16), ((0, 0), (pad, pad), (0, 0)))
        out = jnp.zeros(x.shape[:2] + (w.shape[-1],), jnp.float32) + b
        for k in range(K):
            out = out + jnp.einsum(
                "blc,cd->bld", xp[:, k:k + L, :], w[k].astype(jnp.bfloat16),
                preferred_element_type=jnp.float32)
        return out
    emb = params["embedding"][token_ids]
    o = jnp.maximum(conv_ref(emb, params["w1"], params["b1"], 5, 2), 0.0)
    o = jnp.maximum(conv_ref(o, params["w2"], params["b2"], 3, 1), 0.0)
    return conv_ref(o, params["w3"], params["b3"], 1, 0)


if __name__ == "__main__":
    VOCAB_SIZE = 50
    EMBEDDING_DIM = 32
    MAX_LEN = 16
    BATCH = 2
    NUM_CLASSES = 5  # 1 + len(CATEGORIES) with 4 categories

    key = jax.random.PRNGKey(0)
    k_tok, k_par = jax.random.split(key)
    params = init_params(k_par, VOCAB_SIZE, EMBEDDING_DIM, NUM_CLASSES)
    token_ids = jax.random.randint(k_tok, (BATCH, MAX_LEN), 0, VOCAB_SIZE,
                                   dtype=jnp.int32)

    prepped = prepare_params(params)               # hoisted, one-time weight prep
    fwd = jax.jit(functools.partial(cnn_classifier_forward,
                                    num_classes=NUM_CLASSES))

    logits = jax.block_until_ready(fwd(token_ids, prepped))
    assert logits.shape == (BATCH, MAX_LEN, NUM_CLASSES), logits.shape

    ref = jax.block_until_ready(_reference_forward(token_ids, params))
    max_err = float(jnp.max(jnp.abs(logits - ref)))
    assert jnp.allclose(logits, ref, atol=1e-3, rtol=1e-3), (
        f"mismatch vs reference, max abs err {max_err}")

    print("KERNEL_OK")
</pallas_src>

<mosaic_0001>
module attributes {stable_mosaic.version = 11 : i64} {
  func.func @_fused_cnn_kernel(%arg0: i32, %arg1: memref<8x16x1xi32, #tpu.memory_space<vmem>>, %arg2: memref<128x32xbf16, #tpu.memory_space<vmem>>, %arg3: memref<5x32x128xbf16, #tpu.memory_space<vmem>>, %arg4: memref<1x128xf32, #tpu.memory_space<vmem>>, %arg5: memref<3x128x128xbf16, #tpu.memory_space<vmem>>, %arg6: memref<1x128xf32, #tpu.memory_space<vmem>>, %arg7: memref<128x8xbf16, #tpu.memory_space<vmem>>, %arg8: memref<1x8xf32, #tpu.memory_space<vmem>>, %arg9: memref<8x16x8xf32, #tpu.memory_space<vmem>>) attributes {dimension_semantics = [#tpu.dimension_semantics<parallel>], iteration_bounds = array<i64: 1>, scalar_prefetch = 0 : i64, scratch_operands = 0 : i64, tpu.core_type = #tpu.core_type<tc>, window_params = [{transform_indices = @transform_0, window_bounds = array<i64: 8, 16, 1>}, {pipeline_mode = #tpu.pipeline_mode<synchronous>, transform_indices = @transform_1, window_bounds = array<i64: 128, 32>}, {pipeline_mode = #tpu.pipeline_mode<synchronous>, transform_indices = @transform_2, window_bounds = array<i64: 5, 32, 128>}, {pipeline_mode = #tpu.pipeline_mode<synchronous>, transform_indices = @transform_3, window_bounds = array<i64: 1, 128>}, {pipeline_mode = #tpu.pipeline_mode<synchronous>, transform_indices = @transform_4, window_bounds = array<i64: 3, 128, 128>}, {pipeline_mode = #tpu.pipeline_mode<synchronous>, transform_indices = @transform_5, window_bounds = array<i64: 1, 128>}, {pipeline_mode = #tpu.pipeline_mode<synchronous>, transform_indices = @transform_6, window_bounds = array<i64: 128, 8>}, {pipeline_mode = #tpu.pipeline_mode<synchronous>, transform_indices = @transform_7, window_bounds = array<i64: 1, 8>}, {transform_indices = @transform_8, window_bounds = array<i64: 8, 16, 8>}]} {
    %c0 = arith.constant 0 : index
    %c0_0 = arith.constant 0 : index
    %c0_1 = arith.constant 0 : index
    %0 = vector.load %arg1[%c0, %c0_0, %c0_1] : memref<8x16x1xi32, #tpu.memory_space<vmem>>, vector<8x16x1xi32>
    %1 = tpu.iota {dimensions = array<i32: 2>} : vector<8x16x128xi32>
    %2 = vector.broadcast %0 : vector<8x16x1xi32> to vector<8x16x128xi32>
    %3 = arith.cmpi eq, %1, %2 : vector<8x16x128xi32>
    %4 = arith.extui %3 : vector<8x16x128xi1> to vector<8x16x128xi32>
    %5 = arith.sitofp %4 : vector<8x16x128xi32> to vector<8x16x128xf32>
    %6 = arith.truncf %5 : vector<8x16x128xf32> to vector<8x16x128xbf16>
    %7 = vector.shape_cast %6 : vector<8x16x128xbf16> to vector<128x128xbf16>
    %c0_2 = arith.constant 0 : index
    %c0_3 = arith.constant 0 : index
    %8 = vector.load %arg2[%c0_2, %c0_3] : memref<128x32xbf16, #tpu.memory_space<vmem>>, vector<128x32xbf16>
    %cst = arith.constant dense<0.000000e+00> : vector<128x32xf32>
    %9 = tpu.matmul %7, %8, %cst {dimension_numbers = #tpu.dot_dimension_numbers<[1], [0], [0], [1], [0, 0, 1, 1], [], []>} : vector<128x128xbf16>, vector<128x32xbf16>, vector<128x32xf32> -> vector<128x32xf32>
    %10 = arith.truncf %9 : vector<128x32xf32> to vector<128x32xbf16>
    %11 = vector.shape_cast %10 : vector<128x32xbf16> to vector<8x16x32xbf16>
    %cst_4 = arith.constant 0.000000e+00 : bf16
    %12 = vector.broadcast %cst_4 : bf16 to vector<8x2x32xbf16>
    %13 = tpu.concatenate %12, %11, %12 in 1 : vector<8x2x32xbf16>, vector<8x16x32xbf16>, vector<8x2x32xbf16> -> vector<8x20x32xbf16>
    %14 = vector.extract_strided_slice %13 {offsets = [0, 0, 0], sizes = [8, 16, 32], strides = [1, 1, 1]} : vector<8x20x32xbf16> to vector<8x16x32xbf16>
    %15 = vector.extract_strided_slice %13 {offsets = [0, 1, 0], sizes = [8, 16, 32], strides = [1, 1, 1]} : vector<8x20x32xbf16> to vector<8x16x32xbf16>
    %16 = vector.extract_strided_slice %13 {offsets = [0, 2, 0], sizes = [8, 16, 32], strides = [1, 1, 1]} : vector<8x20x32xbf16> to vector<8x16x32xbf16>
    %17 = vector.extract_strided_slice %13 {offsets = [0, 3, 0], sizes = [8, 16, 32], strides = [1, 1, 1]} : vector<8x20x32xbf16> to vector<8x16x32xbf16>
    %18 = vector.extract_strided_slice %13 {offsets = [0, 4, 0], sizes = [8, 16, 32], strides = [1, 1, 1]} : vector<8x20x32xbf16> to vector<8x16x32xbf16>
    %19 = tpu.concatenate %14, %15, %16, %17, %18 in 2 : vector<8x16x32xbf16>, vector<8x16x32xbf16>, vector<8x16x32xbf16>, vector<8x16x32xbf16>, vector<8x16x32xbf16> -> vector<8x16x160xbf16>
    %20 = vector.shape_cast %19 : vector<8x16x160xbf16> to vector<128x160xbf16>
    %c0_5 = arith.constant 0 : index
    %c0_6 = arith.constant 0 : index
    %c0_7 = arith.constant 0 : index
    %21 = vector.load %arg3[%c0_5, %c0_6, %c0_7] : memref<5x32x128xbf16, #tpu.memory_space<vmem>>, vector<5x32x128xbf16>
    %22 = vector.shape_cast %21 : vector<5x32x128xbf16> to vector<160x128xbf16>
    %cst_8 = arith.constant dense<0.000000e+00> : vector<128x128xf32>
    %23 = tpu.matmul %20, %22, %cst_8 {dimension_numbers = #tpu.dot_dimension_numbers<[1], [0], [0], [1], [0, 0, 1, 1], [], []>} : vector<128x160xbf16>, vector<160x128xbf16>, vector<128x128xf32> -> vector<128x128xf32>
    %c0_9 = arith.constant 0 : index
    %c0_10 = arith.constant 0 : index
    %24 = vector.load %arg4[%c0_9, %c0_10] : memref<1x128xf32, #tpu.memory_space<vmem>>, vector<1x128xf32>
    %25 = vector.shape_cast %24 : vector<1x128xf32> to vector<128xf32>
    %26 = vector.shape_cast %25 : vector<128xf32> to vector<1x128xf32>
    %27 = vector.broadcast %26 : vector<1x128xf32> to vector<128x128xf32>
    %28 = arith.addf %23, %27 : vector<128x128xf32>
    %cst_11 = arith.constant 0.000000e+00 : f32
    %29 = vector.broadcast %cst_11 : f32 to vector<128x128xf32>
    %30 = arith.maximumf %28, %29 : vector<128x128xf32>
    %31 = arith.truncf %30 : vector<128x128xf32> to vector<128x128xbf16>
    %32 = vector.shape_cast %31 : vector<128x128xbf16> to vector<8x16x128xbf16>
    %cst_12 = arith.constant 0.000000e+00 : bf16
    %33 = vector.broadcast %cst_12 : bf16 to vector<8x1x128xbf16>
    %34 = tpu.concatenate %33, %32, %33 in 1 : vector<8x1x128xbf16>, vector<8x16x128xbf16>, vector<8x1x128xbf16> -> vector<8x18x128xbf16>
    %35 = vector.extract_strided_slice %34 {offsets = [0, 0, 0], sizes = [8, 16, 128], strides = [1, 1, 1]} : vector<8x18x128xbf16> to vector<8x16x128xbf16>
    %36 = vector.extract_strided_slice %34 {offsets = [0, 1, 0], sizes = [8, 16, 128], strides = [1, 1, 1]} : vector<8x18x128xbf16> to vector<8x16x128xbf16>
    %37 = vector.extract_strided_slice %34 {offsets = [0, 2, 0], sizes = [8, 16, 128], strides = [1, 1, 1]} : vector<8x18x128xbf16> to vector<8x16x128xbf16>
    %38 = tpu.concatenate %35, %36, %37 in 2 : vector<8x16x128xbf16>, vector<8x16x128xbf16>, vector<8x16x128xbf16> -> vector<8x16x384xbf16>
    %39 = vector.shape_cast %38 : vector<8x16x384xbf16> to vector<128x384xbf16>
    %c0_13 = arith.constant 0 : index
    %c0_14 = arith.constant 0 : index
    %c0_15 = arith.constant 0 : index
    %40 = vector.load %arg5[%c0_13, %c0_14, %c0_15] : memref<3x128x128xbf16, #tpu.memory_space<vmem>>, vector<3x128x128xbf16>
    %41 = vector.shape_cast %40 : vector<3x128x128xbf16> to vector<384x128xbf16>
    %cst_16 = arith.constant dense<0.000000e+00> : vector<128x128xf32>
    %42 = tpu.matmul %39, %41, %cst_16 {dimension_numbers = #tpu.dot_dimension_numbers<[1], [0], [0], [1], [0, 0, 1, 1], [], []>} : vector<128x384xbf16>, vector<384x128xbf16>, vector<128x128xf32> -> vector<128x128xf32>
    %c0_17 = arith.constant 0 : index
    %c0_18 = arith.constant 0 : index
    %43 = vector.load %arg6[%c0_17, %c0_18] : memref<1x128xf32, #tpu.memory_space<vmem>>, vector<1x128xf32>
    %44 = vector.shape_cast %43 : vector<1x128xf32> to vector<128xf32>
    %45 = vector.shape_cast %44 : vector<128xf32> to vector<1x128xf32>
    %46 = vector.broadcast %45 : vector<1x128xf32> to vector<128x128xf32>
    %47 = arith.addf %42, %46 : vector<128x128xf32>
    %cst_19 = arith.constant 0.000000e+00 : f32
    %48 = vector.broadcast %cst_19 : f32 to vector<128x128xf32>
    %49 = arith.maximumf %47, %48 : vector<128x128xf32>
    %50 = arith.truncf %49 : vector<128x128xf32> to vector<128x128xbf16>
    %c0_20 = arith.constant 0 : index
    %c0_21 = arith.constant 0 : index
    %51 = vector.load %arg7[%c0_20, %c0_21] : memref<128x8xbf16, #tpu.memory_space<vmem>>, vector<128x8xbf16>
    %cst_22 = arith.constant dense<0.000000e+00> : vector<128x8xf32>
    %52 = tpu.matmul %50, %51, %cst_22 {dimension_numbers = #tpu.dot_dimension_numbers<[1], [0], [0], [1], [0, 0, 1, 1], [], []>} : vector<128x128xbf16>, vector<128x8xbf16>, vector<128x8xf32> -> vector<128x8xf32>
    %c0_23 = arith.constant 0 : index
    %c0_24 = arith.constant 0 : index
    %53 = vector.load %arg8[%c0_23, %c0_24] : memref<1x8xf32, #tpu.memory_space<vmem>>, vector<1x8xf32>
    %54 = vector.shape_cast %53 : vector<1x8xf32> to vector<8xf32>
    %55 = vector.shape_cast %54 : vector<8xf32> to vector<1x8xf32>
    %56 = vector.broadcast %55 : vector<1x8xf32> to vector<128x8xf32>
    %57 = arith.addf %52, %56 : vector<128x8xf32>
    %58 = vector.shape_cast %57 : vector<128x8xf32> to vector<8x16x8xf32>
    %c0_25 = arith.constant 0 : index
    %c0_26 = arith.constant 0 : index
    %c0_27 = arith.constant 0 : index
    %59 = vector.load %arg9[%c0_25, %c0_26, %c0_27] : memref<8x16x8xf32, #tpu.memory_space<vmem>>, vector<8x16x8xf32>
    tpu.vector_store %arg9[%c0_25, %c0_26, %c0_27], %58 {strides = array<i32>} : memref<8x16x8xf32, #tpu.memory_space<vmem>>, vector<8x16x8xf32>,
    return
  }
  func.func @transform_0(%arg0: i32) -> (i32, i32, i32) {
    %c0_i32 = arith.constant 0 : i32
    %c0_i32_0 = arith.constant 0 : i32
    %c0_i32_1 = arith.constant 0 : i32
    return %arg0, %c0_i32, %c0_i32_0 : i32, i32, i32
  }
  func.func @transform_1(%arg0: i32) -> (i32, i32) {
    %c0_i32 = arith.constant 0 : i32
    %c0_i32_0 = arith.constant 0 : i32
    %c0_i32_1 = arith.constant 0 : i32
    return %c0_i32, %c0_i32_0 : i32, i32
  }
  func.func @transform_2(%arg0: i32) -> (i32, i32, i32) {
    %c0_i32 = arith.constant 0 : i32
    %c0_i32_0 = arith.constant 0 : i32
    %c0_i32_1 = arith.constant 0 : i32
    %c0_i32_2 = arith.constant 0 : i32
    return %c0_i32, %c0_i32_0, %c0_i32_1 : i32, i32, i32
  }
  func.func @transform_3(%arg0: i32) -> (i32, i32) {
    %c0_i32 = arith.constant 0 : i32
    %c0_i32_0 = arith.constant 0 : i32
    %c0_i32_1 = arith.constant 0 : i32
    return %c0_i32, %c0_i32_0 : i32, i32
  }
  func.func @transform_4(%arg0: i32) -> (i32, i32, i32) {
    %c0_i32 = arith.constant 0 : i32
    %c0_i32_0 = arith.constant 0 : i32
    %c0_i32_1 = arith.constant 0 : i32
    %c0_i32_2 = arith.constant 0 : i32
    return %c0_i32, %c0_i32_0, %c0_i32_1 : i32, i32, i32
  }
  func.func @transform_5(%arg0: i32) -> (i32, i32) {
    %c0_i32 = arith.constant 0 : i32
    %c0_i32_0 = arith.constant 0 : i32
    %c0_i32_1 = arith.constant 0 : i32
    return %c0_i32, %c0_i32_0 : i32, i32
  }
  func.func @transform_6(%arg0: i32) -> (i32, i32) {
    %c0_i32 = arith.constant 0 : i32
    %c0_i32_0 = arith.constant 0 : i32
    %c0_i32_1 = arith.constant 0 : i32
    return %c0_i32, %c0_i32_0 : i32, i32
  }
  func.func @transform_7(%arg0: i32) -> (i32, i32) {
    %c0_i32 = arith.constant 0 : i32
    %c0_i32_0 = arith.constant 0 : i32
    %c0_i32_1 = arith.constant 0 : i32
    return %c0_i32, %c0_i32_0 : i32, i32
  }
  func.func @transform_8(%arg0: i32) -> (i32, i32, i32) {
    %c0_i32 = arith.constant 0 : i32
    %c0_i32_0 = arith.constant 0 : i32
    %c0_i32_1 = arith.constant 0 : i32
    return %arg0, %c0_i32, %c0_i32_0 : i32, i32, i32
  }
}

</mosaic_0001>

<bundles_post_ra>
// kernel: cnn_classifier_forward.1
= control target key start
LH: loop header
LB: loop body
LE: loop exit
PB: predicated region body
PF: predicated region fallthrough
CT: control target
= control target key end

     0   :  { %v2145_v0 = vmov 0   ;;  %v46_v25 = vlaneseq  ;;  %v2146_v31 = vmov 1.0|1.0   ;;  %s2148_s27 = smov 32   ;;  %s2149_s28 = smov 96   ;;  %s2804_s0 = inlined_call_operand.vmem [shape: s32[8,16,1], index: 0, kind: input, shape index: {}]   ;;  %s2805_s1 = inlined_call_operand.vmem [shape: bf16[128,32], index: 1, kind: input, shape index: {}]   ;;  %s2806_s2 = inlined_call_operand.vmem [shape: bf16[5,32,128], index: 2, kind: input, shape index: {}]   ;;  %s2807_s4 = inlined_call_operand.vmem [shape: bf16[3,128,128], index: 4, kind: input, shape index: {}]   ;;  %s2808_s6 = inlined_call_operand.vmem [shape: bf16[128,8], index: 6, kind: input, shape index: {}]   ;;  %s2809_s3 = inlined_call_operand.vmem [shape: f32[1,128], index: 3, kind: input, shape index: {}]   ;;  %s2810_s5 = inlined_call_operand.vmem [shape: f32[1,128], index: 5, kind: input, shape index: {}]   ;;  %s2811_s7 = inlined_call_operand.vmem [shape: f32[1,8], index: 7, kind: input, shape index: {}]   ;;  %s2812_s8 = inlined_call_operand.vmem [shape: f32[8,16,8], index: 8, kind: output, shape index: {}]  }
   0x1   :  { %2094 = vset.pattern.permute.xlu1 %v2145_v0  ;;  %2093 = vset.pattern.permute.xlu0 %v2145_v0  ;;  %v32_v1 = vld [vmem:[%s2804_s0 + $0x10] sm:$0xff]  ;;  %v30_v2 = vld [vmem:[%s2804_s0] sm:$0xff]  ;;  %v33_v3 = vld [vmem:[%s2804_s0 + $0x18] sm:$0xff] }
   0x2   :  { %55 = vperm.xlu1 %2094, %v32_v1   ;;  %49 = vperm.xlu0 %2093, %v30_v2   ;;  %v31_v4 = vld [vmem:[%s2804_s0 + $0x8] sm:$0xff]  ;;  %v34_v6 = vld [vmem:[%s2804_s0 + $0x20] sm:$0xff]  ;;  %v37_v9 = vld [vmem:[%s2804_s0 + $0x38] sm:$0xff]  ;;  %v47_v28 = vand.u32 127, %v46_v25 }
   0x3   :  { %801 = vmatprep.subr.bf16.mxu1 %v2145_v0  ;;  %v35_v5 = vld [vmem:[%s2804_s0 + $0x28] sm:$0xff]  ;;  %v2095_v7 = vld [vmem:[%s2805_s1] sm:$0xff]   ;;  %v36_v10 = vld [vmem:[%s2804_s0 + $0x30] sm:$0xff] }
   0x4   :  { %v2096_v8 = vld [vmem:[%s2805_s1 + $0x8] sm:$0xff]   ;;  %1976 = vmatprep.subr.bf16.mxu0 %v2095_v7  ;;  %v2097_v11 = vld [vmem:[%s2805_s1 + $0x10] sm:$0xff]   ;;  %v38_v13 = vld [vmem:[%s2804_s0 + $0x40] sm:$0xff] }
   0x5   :  { %1977 = vmatpush3.bf16.msra.mxu0 %v2095_v7  ;;  %v39_v12 = vld [vmem:[%s2804_s0 + $0x48] sm:$0xff]  ;;  %v2098_v14 = vld [vmem:[%s2805_s1 + $0x18] sm:$0xff]   ;;  %v40_v16 = vld [vmem:[%s2804_s0 + $0x50] sm:$0xff] }
   0x6   :  { %58 = vperm.xlu1 %2094, %v33_v3   ;;  %52 = vperm.xlu0 %2093, %v31_v4   ;;  %v41_v15 = vld [vmem:[%s2804_s0 + $0x58] sm:$0xff]  ;;  %v2099_v17 = vld [vmem:[%s2805_s1 + $0x20] sm:$0xff]   ;;  %v43_v18 = vld [vmem:[%s2804_s0 + $0x68] sm:$0xff] }
   0x7   :  { %1978 = vmatprep.subr.bf16.mxu0 %v2096_v8  ;;  %v42_v19 = vld [vmem:[%s2804_s0 + $0x60] sm:$0xff]  ;;  %v2100_v20 = vld [vmem:[%s2805_s1 + $0x28] sm:$0xff]   ;;  %v45_v21 = vld [vmem:[%s2804_s0 + $0x78] sm:$0xff] }
   0x8   :  { %v44_v22 = vld [vmem:[%s2804_s0 + $0x70] sm:$0xff]  ;;  %v2102_v24 = vld [vmem:[%s2805_s1 + $0x38] sm:$0xff]   ;;  %v2103_v44 = vld [vmem:[%s2806_s2] sm:$0xff]  }
   0x9   :  { %1979 = vmatpush3.bf16.msra.mxu0 %v2096_v8  ;;  %v2101_v23 = vld [vmem:[%s2805_s1 + $0x30] sm:$0xff]   ;;  %802 = vmatpush1.bf16.msra.mxu1 %v2103_v44  ;;  %v2104_v45 = vld [vmem:[%s2806_s2 + $0x8] sm:$0xff]   ;;  %v2106_v47 = vld [vmem:[%s2806_s2 + $0x18] sm:$0xff]  }
   0xa   :  { %64 = vperm.xlu1 %2094, %v35_v5   ;;  %61 = vperm.xlu0 %2093, %v34_v6   ;;  %v2105_v46 = vld [vmem:[%s2806_s2 + $0x10] sm:$0xff]   ;;  %v2107_v48 = vld [vmem:[%s2806_s2 + $0x20] sm:$0xff]   ;;  %v2108_v49 = vld [vmem:[%s2806_s2 + $0x28] sm:$0xff]  }
   0xb   :  { %1980 = vmatprep.subr.bf16.mxu0 %v2097_v11  ;;  %803 = vmatprep.subr.bf16.mxu1 %v2145_v0  ;;  %v2109_v50 = vld [vmem:[%s2806_s2 + $0x30] sm:$0xff]   ;;  %v2110_v51 = vld [vmem:[%s2806_s2 + $0x38] sm:$0xff]   ;;  %v2111_v54 = vld [vmem:[%s2806_s2 + $0x40] sm:$0xff]  }
   0xc   :  { %v2112_v63 = vld [vmem:[%s2806_s2 + $0x48] sm:$0xff]   ;;  %s2147_s2 = smov 64  }
   0xd   :  { %1981 = vmatpush3.bf16.msra.mxu0 %v2097_v11  ;;  %804 = vmatpush1.bf16.msra.mxu1 %v2104_v45 }
   0xe   :  { %70 = vperm.xlu1 %2094, %v37_v9   ;;  %67 = vperm.xlu0 %2093, %v36_v10  }
   0xf   :  { %1982 = vmatprep.subr.bf16.mxu0 %v2098_v14  ;;  %805 = vmatprep.subr.bf16.mxu1 %v2145_v0 }
  0x11   :  { %1983 = vmatpush3.bf16.msra.mxu0 %v2098_v14  ;;  %806 = vmatpush1.bf16.msra.mxu1 %v2105_v46 }
  0x12   :  { %76 = vperm.xlu1 %2094, %v39_v12   ;;  %73 = vperm.xlu0 %2093, %v38_v13  }
  0x13   :  { %1984 = vmatprep.subr.bf16.mxu0 %v2099_v17  ;;  %807 = vmatprep.subr.bf16.mxu1 %v2145_v0 }
  0x15   :  { %1985 = vmatpush3.bf16.msra.mxu0 %v2099_v17  ;;  %808 = vmatpush1.bf16.msra.mxu1 %v2106_v47 }
  0x16   :  { %82 = vperm.xlu1 %2094, %v41_v15   ;;  %79 = vperm.xlu0 %2093, %v40_v16  }
  0x17   :  { %1986 = vmatprep.subr.bf16.mxu0 %v2100_v20  ;;  %809 = vmatprep.subr.bf16.mxu1 %v2145_v0 }
  0x19   :  { %1987 = vmatpush3.bf16.msra.mxu0 %v2100_v20  ;;  %810 = vmatpush1.bf16.msra.mxu1 %v2107_v48 }
  0x1a   :  { %88 = vperm.xlu1 %2094, %v43_v18   ;;  %85 = vperm.xlu0 %2093, %v42_v19  }
  0x1b   :  { %1988 = vmatprep.subr.bf16.mxu0 %v2101_v23  ;;  %811 = vmatprep.subr.bf16.mxu1 %v2145_v0 }
  0x1d   :  { %1989 = vmatpush3.bf16.msra.mxu0 %v2101_v23  ;;  %812 = vmatpush1.bf16.msra.mxu1 %v2108_v49 }
  0x1e   :  { %94 = vperm.xlu1 %2094, %v45_v21   ;;  %91 = vperm.xlu0 %2093, %v44_v22  }
  0x1f   :  { %1990 = vmatprep.subr.bf16.mxu0 %v2102_v24  ;;  %813 = vmatprep.subr.bf16.mxu1 %v2145_v0 }
  0x21   :  { %1991 = vmatpush3.bf16.msra.mxu0 %v2102_v24  ;;  %814 = vmatpush1.bf16.msra.mxu1 %v2109_v50 }
  0x22   :  { %815 = vmatprep.subr.bf16.mxu1 %v2145_v0 }
  0x25   :  { %816 = vmatpush1.bf16.msra.mxu1 %v2110_v51 }
  0x26   :  { %817 = vmatprep.subr.bf16.mxu1 %v2145_v0 }
  0x29   :  { %818 = vmatpush1.bf16.msra.mxu1 %v2111_v54 }
  0x2a   :  { %819 = vmatprep.subr.bf16.mxu1 %v2145_v0 }
  0x2d   :  { %820 = vmatpush1.bf16.msra.mxu1 %v2112_v63 }
  0x81   :  { %v56_v26 = vpop.permute.xlu1 %55  ;;  %v50_v27 = vpop.permute.xlu0 %49 }
  0x82   :  { %vm98_vm0 = vcmp.eq.s32.totalorder %v47_v28, %v56_v26  ;;  %vm96_vm3 = vcmp.eq.s32.totalorder %v47_v28, %v50_v27 }
  0x85   :  { %v59_v29 = vpop.permute.xlu1 %58  ;;  %v53_v30 = vpop.permute.xlu0 %52 }
  0x86   :  { %vm99_vm1 = vcmp.eq.s32.totalorder %v47_v28, %v59_v29  ;;  %vm97_vm2 = vcmp.eq.s32.totalorder %v47_v28, %v53_v30 }
  0x87   :  { %vm1797_vm4 = vmpackc.low %vm99_vm1, %vm98_vm0 }
  0x88   :  { %vm1795_vm5 = vmpackc.low %vm97_vm2, %vm96_vm3 }
  0x89   :  { %1992 = vmatprep.mubr.msk.bf16.mxu0 %vm1795_vm5, %v2146_v31  ;;  %v65_v32 = vpop.permute.xlu1 %64  ;;  %v62_v33 = vpop.permute.xlu0 %61 }
  0x8a   :  { %vm101_vm6 = vcmp.eq.s32.totalorder %v47_v28, %v65_v32  ;;  %1993 = vmatmul.mubr.msk.bf16.vlgmr.msra.gmra.mrb[0].mxu0 %vm1797_vm4, %v2146_v31  ;;  %vm100_vm7 = vcmp.eq.s32.totalorder %v47_v28, %v62_v33 }
  0x8b   :  { %vm1799_vm8 = vmpackc.low %vm101_vm6, %vm100_vm7 }
  0x8c   :  { %1996 = vmatprep.mubr.msk.bf16.mxu0 %vm1799_vm8, %v2146_v31  ;;  %vm337_vm8 = vcmask 1040384  }
  0x8d   :  { %v71_v34 = vpop.permute.xlu1 %70  ;;  %v68_v35 = vpop.permute.xlu0 %67 }
  0x8e   :  { %vm103_vm9 = vcmp.eq.s32.totalorder %v47_v28, %v71_v34  ;;  %vm102_vm10 = vcmp.eq.s32.totalorder %v47_v28, %v68_v35 }
  0x8f   :  { %vm1801_vm11 = vmpackc.low %vm103_vm9, %vm102_vm10  ;;  %vm606_vm9 = vcmask 1045504   ;;  %vm631_vm10 = vcmask 261120  }
  0x91   :  { %v77_v36 = vpop.permute.xlu1 %76  ;;  %v74_v37 = vpop.permute.xlu0 %73 }
  0x92   :  { %vm105_vm12 = vcmp.eq.s32.totalorder %v47_v28, %v77_v36  ;;  %1997 = vmatmul.mubr.msk.bf16.gmra.mrb[4].mxu0 %vm1801_vm11, %v2146_v31  ;;  %vm104_vm13 = vcmp.eq.s32.totalorder %v47_v28, %v74_v37  ;;  %vm476_vm11 = vcmask 1046528  }
  0x93   :  { %vm1803_vm14 = vmpackc.low %vm105_vm12, %vm104_vm13  ;;  %vm363_vm12 = vsmask.f32 7424  ;;  %vm517_vm13 = vsmask.f32 6400 }
  0x94   :  { %2000 = vmatprep.mubr.msk.bf16.mxu0 %vm1803_vm14, %v2146_v31  ;;  %vm648_vm14 = vcmask 523264  }
  0x95   :  { %v83_v38 = vpop.permute.xlu1 %82  ;;  %v80_v39 = vpop.permute.xlu0 %79 }
  0x96   :  { %vm107_vm15 = vcmp.eq.s32.totalorder %v47_v28, %v83_v38  ;;  %vm106_vm0 = vcmp.eq.s32.totalorder %v47_v28, %v80_v39 }
  0x97   :  { %vm1805_vm1 = vmpackc.low %vm107_vm15, %vm106_vm0  ;;  %vm665_vm15 = vcmask 785408   ;;  %vm995_vm0 = vsmask.f32 256 }
  0x99   :  { %v89_v40 = vpop.permute.xlu1 %88  ;;  %v86_v41 = vpop.permute.xlu0 %85 }
  0x9a   :  { %vm109_vm2 = vcmp.eq.s32.totalorder %v47_v28, %v89_v40  ;;  %2001 = vmatmul.mubr.msk.bf16.gmra.mrb[8].mxu0 %vm1805_vm1, %v2146_v31  ;;  %vm108_vm3 = vcmp.eq.s32.totalorder %v47_v28, %v86_v41  ;;  %vm2628_vm1 = vmand %vm337_vm8, %vm995_vm0 }
  0x9b   :  { %vm1807_vm4 = vmpackc.low %vm109_vm2, %vm108_vm3  ;;  %vm1750_vm2 = vcmask 64512  }
  0x9c   :  { %2004 = vmatprep.mubr.msk.bf16.mxu0 %vm1807_vm4, %v2146_v31 }
  0x9d   :  { %v95_v42 = vpop.permute.xlu1 %94  ;;  %v92_v43 = vpop.permute.xlu0 %91 }
  0x9e   :  { %vm111_vm5 = vcmp.eq.s32.totalorder %v47_v28, %v95_v42  ;;  %vm110_vm6 = vcmp.eq.s32.totalorder %v47_v28, %v92_v43 }
  0x9f   :  { %vm1809_vm7 = vmpackc.low %vm111_vm5, %vm110_vm6 }
  0xa2   :  { %2005 = vmatmul.mubr.msk.bf16.gmra.mrb[12].mxu0 %vm1809_vm7, %v2146_v31 }
 0x15d   :  { %v1994_v52 = vpop.f32.mrb[0].mxu0 }
 0x15e   :  { %v250_v53 = vpop.f32.mrb[1].mxu0 }
 0x15f   :  { %v1995_v55 = vpop.f32.mrb[2].mxu0 }
 0x160   :  { %v314_v56 = vpack.c.bf16 %v1995_v55, %v1994_v52  ;;  %v253_v57 = vpop.f32.mrb[3].mxu0 }
 0x161   :  { %v313_v58 = vpack.c.bf16 %v253_v57, %v250_v53 }
 0x162   :  { %v330_v59 = vrot.slane %v314_v56, 7 }
 0x163   :  { %v329_v60 = vrot.slane %v313_v58, 7 }
 0x164   :  { %v2307_v61 = vsel %vm337_vm8, 0, %v330_v59  ;;  %v2310_v62 = vsel %vm337_vm8, %v330_v59, 0 }
 0x165   :  { %v376_v1 = vshll.u32 %v2307_v61, 16  ;;  %v1998_v2 = vpop.f32.mrb[4].mxu0  ;;  %v2317_v3 = vsel %vm337_vm8, 0, %v329_v60  ;;  %v355_v0 = vsel %vm337_vm8, %v329_v60, 0  ;;  %v380_v5 = vshll.u32 %v2310_v62, 16 }
 0x166   :  { %v266_v4 = vpop.f32.mrb[5].mxu0  ;;  %v366_v6 = vshll.u32 %v2317_v3, 16  ;;  %v607_v10 = vrot.slane %v2317_v3, 2  ;;  %v608_v11 = vrot.slane %v355_v0, 2  ;;  %v477_v12 = vrot.slane %v2317_v3, 1 }
 0x167   :  { %v1999_v7 = vpop.f32.mrb[6].mxu0  ;;  %v478_v14 = vrot.slane %v355_v0, 1  ;;  %v374_v15 = vshrl.u32 %v2307_v61, 16  ;;  %v378_v16 = vrot.slane %v376_v1, 1  ;;  %v370_v17 = vshll.u32 %v355_v0, 16 }
 0x168   :  { %v316_v8 = vpack.c.bf16 %v1999_v7, %v1998_v2  ;;  %v269_v9 = vpop.f32.mrb[7].mxu0  ;;  %v609_v18 = vsel %vm606_vm9, %v607_v10, %v608_v11  ;;  %v530_v19 = vshrl.u32 %v2310_v62, 16  ;;  %v368_v22 = vrot.slane %v366_v6, 1 }
 0x169   :  { %v315_v13 = vpack.c.bf16 %v269_v9, %v266_v4  ;;  %1822 = vmatprep.mubr.msk.bf16.mxu1 %vm631_vm10, %v609_v18  ;;  %v479_v20 = vsel %vm476_vm11, %v477_v12, %v478_v14  ;;  %v379_v21 = vor.u32 %v378_v16, %v374_v15  ;;  %v521_v23 = vshrl.u32 %v355_v0, 16 }
 0x16a   :  { %501 = vrot.lane.b32.xlu1 %v479_v20, %s2147_s2  ;;  %v382_v24 = vrot.slane %v380_v5, 1  ;;  %v364_v25 = vshrl.u32 %v2317_v3, 16  ;;  %v332_v26 = vrot.slane %v316_v8, 7  ;;  %v372_v30 = vrot.slane %v370_v17, 1 }
 0x16b   :  { %v527_v32 = vrot.slane %v374_v15, 1  ;;  %v532_v33 = vrot.slane %v530_v19, 1  ;;  %v331_v34 = vrot.slane %v315_v13, 7  ;;  %v523_v36 = vrot.slane %v521_v23, 1 }
 0x16c   :  { %v383_v28 = vsel %vm363_vm12, %v379_v21, %v382_v24  ;;  %v369_v29 = vor.u32 %v368_v22, %v364_v25  ;;  %v528_v40 = vrot.slane %v376_v1, 2  ;;  %v2335_v41 = vsel %vm337_vm8, %v332_v26, 0 }
 0x16d   :  { %v2002_v27 = vpop.f32.mrb[8].mxu0  ;;  %v533_v43 = vrot.slane %v380_v5, 2  ;;  %v518_v44 = vrot.slane %v364_v25, 1  ;;  %v2339_v45 = vsel %vm337_vm8, 0, %v332_v26  ;;  %v519_v47 = vrot.slane %v366_v6, 2 }
 0x16e   :  { %v282_v31 = vpop.f32.mrb[9].mxu0  ;;  %446 = vrot.lane.b32.xlu1 %v383_v28, %s2148_s27  ;;  %v373_v37 = vsel %vm363_vm12, %v369_v29, %v372_v30  ;;  %v529_v46 = vor.u32 %v528_v40, %v527_v32  ;;  %v524_v48 = vrot.slane %v370_v17, 2  ;;  %v2342_v49 = vsel %vm337_vm8, 0, %v331_v34 }
 0x16f   :  { %v2003_v35 = vpop.f32.mrb[10].mxu0  ;;  %444 = vrot.lane.b32.xlu0 %v373_v37, %s2148_s27  ;;  %v534_v50 = vor.u32 %v533_v43, %v532_v33  ;;  %v548_v51 = vshrl.u32 %v2335_v41, 16  ;;  %v520_v53 = vor.u32 %v519_v47, %v518_v44  ;;  %v611_v55 = vrot.slane %v2310_v62, 2 }
 0x170   :  { %v318_v38 = vpack.c.bf16 %v2003_v35, %v2002_v27  ;;  %v285_v39 = vpop.f32.mrb[11].mxu0  ;;  %v525_v54 = vor.u32 %v524_v48, %v523_v36  ;;  %v396_v56 = vshll.u32 %v2339_v45, 16  ;;  %v2348_v57 = vsel %vm337_vm8, %v331_v34, 0 }
 0x171   :  { %v317_v42 = vpack.c.bf16 %v285_v39, %v282_v31  ;;  %v480_v58 = vrot.slane %v2307_v61, 1  ;;  %v535_v60 = vsel %vm517_vm13, %v529_v46, %v534_v50  ;;  %v481_v1 = vrot.slane %v2310_v62, 1 }
 0x172   :  { %v334_v52 = vrot.slane %v318_v38, 7  ;;  %v526_v63 = vsel %vm517_vm13, %v520_v53, %v525_v54  ;;  %v483_v2 = vrot.slane %v2342_v49, 1  ;;  %v400_v4 = vshll.u32 %v2335_v41, 16  ;;  %592 = vrot.lane.b32.xlu1 %v535_v60, %s2149_s28 }
 0x173   :  { %v617_v5 = vrot.slane %v2335_v41, 2  ;;  %v386_v6 = vshll.u32 %v2342_v49, 16  ;;  %v333_v7 = vrot.slane %v317_v42, 7  ;;  %590 = vrot.lane.b32.xlu0 %v526_v63, %s2149_s28  ;;  %v550_v9 = vrot.slane %v548_v51, 1 }
 0x174   :  { %v2361_v10 = vsel %vm337_vm8, %v334_v52, 0  ;;  %v484_v11 = vrot.slane %v2348_v57, 1  ;;  %v539_v14 = vshrl.u32 %v2348_v57, 16  ;;  %v394_v16 = vshrl.u32 %v2339_v45, 16 }
 0x175   :  { %v2006_v59 = vpop.f32.mrb[12].mxu0  ;;  %v398_v17 = vrot.slane %v396_v56, 1  ;;  %v390_v18 = vshll.u32 %v2348_v57, 16  ;;  %v2368_v19 = vsel %vm337_vm8, 0, %v334_v52  ;;  %v482_v20 = vsel %vm476_vm11, %v480_v58, %v481_v1 }
 0x176   :  { %v298_v0 = vpop.f32.mrb[13].mxu0  ;;  %v485_v21 = vsel %vm476_vm11, %v483_v2, %v484_v11  ;;  %v566_v22 = vshrl.u32 %v2361_v10, 16  ;;  %v2374_v23 = vsel %vm337_vm8, 0, %v333_v7  ;;  %v388_v25 = vrot.slane %v386_v6, 1 }
 0x177   :  { %v2007_v8 = vpop.f32.mrb[14].mxu0  ;;  %503 = vrot.lane.b32.xlu0 %v482_v20, %s2147_s2  ;;  %505 = vrot.lane.b32.xlu1 %v485_v21, %s2147_s2  ;;  %v399_v24 = vor.u32 %v398_v17, %v394_v16  ;;  %v402_v26 = vrot.slane %v400_v4, 1  ;;  %v384_v27 = vshrl.u32 %v2342_v49, 16  ;;  %v545_v28 = vrot.slane %v394_v16, 1 }
 0x178   :  { %v320_v12 = vpack.c.bf16 %v2007_v8, %v2006_v59  ;;  %v301_v13 = vpop.f32.mrb[15].mxu0  ;;  %v546_v29 = vrot.slane %v396_v56, 2  ;;  %v541_v30 = vrot.slane %v539_v14, 1  ;;  %v614_v31 = vrot.slane %v2348_v57, 2 }
 0x179   :  { %v319_v15 = vpack.c.bf16 %v301_v13, %v298_v0  ;;  %v416_v32 = vshll.u32 %v2368_v19, 16  ;;  %v2382_v33 = vsel %vm337_vm8, %v333_v7, 0  ;;  %v403_v35 = vsel %vm363_vm12, %v399_v24, %v402_v26 }
 0x17a   :  { %v336_v34 = vrot.slane %v320_v12, 7  ;;  %v389_v36 = vor.u32 %v388_v25, %v384_v27  ;;  %v392_v37 = vrot.slane %v390_v18, 1  ;;  %v420_v38 = vshll.u32 %v2361_v10, 16 }
 0x17b   :  { %v2386_v39 = vrot.slane %v566_v22, 1  ;;  %v623_v40 = vrot.slane %v2361_v10, 2  ;;  %v406_v42 = vshll.u32 %v2374_v23, 16  ;;  %450 = vrot.lane.b32.xlu1 %v403_v35, %s2148_s27  ;;  %v410_v43 = vshll.u32 %v2382_v33, 16 }
 0x17c   :  { %v393_v44 = vsel %vm363_vm12, %v389_v36, %v392_v37  ;;  %v547_v46 = vor.u32 %v546_v29, %v545_v28  ;;  %v551_v47 = vrot.slane %v400_v4, 2  ;;  %v557_v48 = vshrl.u32 %v2382_v33, 16 }
 0x17d   :  { %448 = vrot.lane.b32.xlu0 %v393_v44, %s2148_s27  ;;  %v536_v50 = vrot.slane %v384_v27, 1  ;;  %v537_v51 = vrot.slane %v386_v6, 2  ;;  %v542_v52 = vrot.slane %v390_v18, 2  ;;  %v2396_v53 = vsel %vm337_vm8, 0, %v336_v34 }
 0x17e   :  { %v2399_v54 = vsel %vm337_vm8, %v336_v34, 0  ;;  %v335_v56 = vrot.slane %v319_v15, 7  ;;  %v552_v58 = vor.u32 %v551_v47, %v550_v9  ;;  %v486_v63 = vrot.slane %v2339_v45, 1 }
 0x17f   :  { %v538_v59 = vor.u32 %v537_v51, %v536_v50  ;;  %v543_v60 = vor.u32 %v542_v52, %v541_v30  ;;  %v414_v1 = vshrl.u32 %v2368_v19, 16  ;;  %v489_v0 = vrot.slane %v2374_v23, 1 }
 0x180   :  { %v553_v2 = vsel %vm517_vm13, %v547_v46, %v552_v58  ;;  %v490_v4 = vrot.slane %v2382_v33, 1  ;;  %v418_v6 = vrot.slane %v416_v32, 1  ;;  %v487_v8 = vrot.slane %v2335_v41, 1 }
 0x181   :  { %596 = vrot.lane.b32.xlu1 %v553_v2, %s2149_s28  ;;  %v544_v7 = vsel %vm517_vm13, %v538_v59, %v543_v60  ;;  %v404_v9 = vshrl.u32 %v2374_v23, 16  ;;  %v408_v11 = vrot.slane %v406_v42, 1  ;;  %v2411_v12 = vsel %vm337_vm8, 0, %v335_v56 }
 0x182   :  { %v2414_v13 = vsel %vm337_vm8, %v335_v56, 0  ;;  %594 = vrot.lane.b32.xlu0 %v544_v7, %s2149_s28  ;;  %v419_v14 = vor.u32 %v418_v6, %v414_v1  ;;  %v563_v15 = vrot.slane %v414_v1, 1  ;;  %v564_v16 = vrot.slane %v416_v32, 2 }
 0x183   :  { %v569_v17 = vrot.slane %v420_v38, 2  ;;  %v554_v18 = vrot.slane %v404_v9, 1  ;;  %v555_v20 = vrot.slane %v406_v42, 2  ;;  %v559_v21 = vrot.slane %v557_v48, 1 }
 0x184   :  { %v491_v22 = vsel %vm476_vm11, %v489_v0, %v490_v4  ;;  %v422_v24 = vrot.slane %v420_v38, 1  ;;  %v560_v25 = vrot.slane %v410_v43, 2  ;;  %v436_v26 = vshll.u32 %v2396_v53, 16 }
 0x185   :  { %v584_v27 = vshrl.u32 %v2399_v54, 16  ;;  %v488_v28 = vsel %vm476_vm11, %v486_v63, %v487_v8  ;;  %509 = vrot.lane.b32.xlu1 %v491_v22, %s2147_s2  ;;  %v409_v29 = vor.u32 %v408_v11, %v404_v9  ;;  %v426_v30 = vshll.u32 %v2411_v12, 16 }
 0x186   :  { %v575_v32 = vshrl.u32 %v2414_v13, 16  ;;  %507 = vrot.lane.b32.xlu0 %v488_v28, %s2147_s2  ;;  %v423_v34 = vsel %vm363_vm12, %v419_v14, %v422_v24  ;;  %v412_v35 = vrot.slane %v410_v43, 1  ;;  %v565_v36 = vor.u32 %v564_v16, %v563_v15 }
 0x187   :  { %v570_v37 = vor.u32 %v569_v17, %v2386_v39  ;;  %v556_v38 = vor.u32 %v555_v20, %v554_v18  ;;  %v492_v42 = vrot.slane %v2368_v19, 1  ;;  %v561_v44 = vor.u32 %v560_v25, %v559_v21 }
 0x188   :  { %v493_v46 = vrot.slane %v2361_v10, 1  ;;  %v495_v47 = vrot.slane %v2411_v12, 1  ;;  %v496_v48 = vrot.slane %v2414_v13, 1  ;;  %v620_v50 = vrot.slane %v2382_v33, 2 }
 0x189   :  { %454 = vrot.lane.b32.xlu1 %v423_v34, %s2148_s27  ;;  %v413_v51 = vsel %vm363_vm12, %v409_v29, %v412_v35  ;;  %v434_v43 = vshrl.u32 %v2396_v53, 16  ;;  %v438_v52 = vrot.slane %v436_v26, 1  ;;  %v440_v39 = vshll.u32 %v2399_v54, 16 }
 0x18a   :  { %v586_v56 = vrot.slane %v584_v27, 1  ;;  %v629_v58 = vrot.slane %v2399_v54, 2  ;;  %452 = vrot.lane.b32.xlu0 %v413_v51, %s2148_s27  ;;  %v428_v59 = vrot.slane %v426_v30, 1  ;;  %v430_v60 = vshll.u32 %v2414_v13, 16 }
 0x18b   :  { %v577_v63 = vrot.slane %v575_v32, 1  ;;  %v626_v33 = vrot.slane %v2414_v13, 2  ;;  %v424_v1 = vshrl.u32 %v2411_v12, 16  ;;  %v571_v2 = vsel %vm517_vm13, %v565_v36, %v570_v37 }
 0x18c   :  { %v562_v0 = vsel %vm517_vm13, %v556_v38, %v561_v44  ;;  %v494_v4 = vsel %vm476_vm11, %v492_v42, %v493_v46  ;;  %v497_v6 = vsel %vm476_vm11, %v495_v47, %v496_v48  ;;  %v439_v7 = vor.u32 %v438_v52, %v434_v43  ;;  %v2113_v44 = vld [vmem:[%s2807_s4 + $0x40] sm:$0xff]   ;;  %v2117_v48 = vld [vmem:[%s2807_s4 + $0x8] sm:$0xff]  }
 0x18d   :  { %600 = vrot.lane.b32.xlu1 %v571_v2, %s2149_s28  ;;  %v581_v8 = vrot.slane %v434_v43, 1  ;;  %v582_v9 = vrot.slane %v436_v26, 2  ;;  %v610_v11 = vrot.slane %v2307_v61, 2  ;;  %v429_v13 = vor.u32 %v428_v59, %v424_v1  ;;  %v2114_v46 = vld [vmem:[%s2807_s4] sm:$0xff]   ;;  %1880 = vmatprep.subr.bf16.mxu0 %v2113_v44  ;;  %v2119_v59 = vld [vmem:[%s2807_s4 + $0x88] sm:$0xff]  }
 0x18e   :  { %598 = vrot.lane.b32.xlu0 %v562_v0, %s2149_s28  ;;  %v587_v14 = vrot.slane %v440_v39, 2  ;;  %v613_v15 = vrot.slane %v2342_v49, 2  ;;  %v616_v16 = vrot.slane %v2339_v45, 2  ;;  %v572_v17 = vrot.slane %v424_v1, 1  ;;  %v2115_v47 = vld [vmem:[%s2807_s4 + $0x80] sm:$0xff]   ;;  %1881 = vmatpush3.bf16.msra.mxu0 %v2114_v46  ;;  %v2129_v44 = vld [vmem:[%s2807_s4 + $0x28] sm:$0xff]  }
 0x18f   :  { %v612_v18 = vsel %vm606_vm9, %v610_v11, %v611_v55  ;;  %v619_v20 = vrot.slane %v2374_v23, 2  ;;  %v622_v21 = vrot.slane %v2368_v19, 2  ;;  %v625_v25 = vrot.slane %v2411_v12, 2  ;;  %2008 = vmatprep.subr.bf16.mxu1 %v2115_v47  ;;  %v2130_v46 = vld [vmem:[%s2807_s4 + $0x70] sm:$0xff]  }
 0x190   :  { %v2458_v22 = vsel %vm606_vm9, %v613_v15, %v614_v31  ;;  %v2463_v24 = vsel %vm606_vm9, %v616_v16, %v617_v5  ;;  %v628_v62 = vrot.slane %v2396_v53, 2  ;;  %v573_v55 = vrot.slane %v426_v30, 2 }
 0x191   :  { %513 = vrot.lane.b32.xlu1 %v497_v6, %s2147_s2  ;;  %v578_v26 = vrot.slane %v430_v60, 2  ;;  %v2469_v27 = vsel %vm606_vm9, %v619_v20, %v620_v50  ;;  %v2474_v57 = vsel %vm606_vm9, %v622_v21, %v623_v40  ;;  %v442_v41 = vrot.slane %v440_v39, 1  ;;  %v2118_v50 = vld [vmem:[%s2807_s4 + $0x50] sm:$0xff]  }
 0x192   :  { %511 = vrot.lane.b32.xlu0 %v494_v4, %s2147_s2  ;;  %v2478_v5 = vsel %vm606_vm9, %v625_v25, %v626_v33  ;;  %v2481_v31 = vsel %vm606_vm9, %v628_v62, %v629_v58  ;;  %v432_v28 = vrot.slane %v430_v60, 1  ;;  %v583_v30 = vor.u32 %v582_v9, %v581_v8 }
 0x193   :  { %v443_v29 = vsel %vm363_vm12, %v439_v7, %v442_v41  ;;  %v588_v32 = vor.u32 %v587_v14, %v586_v56  ;;  %v574_v40 = vor.u32 %v573_v55, %v572_v17  ;;  %v579_v34 = vor.u32 %v578_v26, %v577_v63 }
 0x194   :  { %v433_v10 = vsel %vm363_vm12, %v429_v13, %v432_v28  ;;  %v498_v37 = vrot.slane %v2396_v53, 1  ;;  %v499_v38 = vrot.slane %v2399_v54, 1  ;;  %v2116_v54 = vld [vmem:[%s2807_s4 + $0x48] sm:$0xff]  }
 0x195   :  { %458 = vrot.lane.b32.xlu1 %v443_v29, %s2148_s27  ;;  %v589_v35 = vsel %vm517_vm13, %v583_v30, %v588_v32  ;;  %v580_v36 = vsel %vm517_vm13, %v574_v40, %v579_v34  ;;  %1882 = vmatprep.subr.bf16.mxu0 %v2116_v54  ;;  %v2121_v34 = vld [vmem:[%s2807_s4 + $0x58] sm:$0xff]   ;;  %v2132_v54 = vld [vmem:[%s2807_s4 + $0x30] sm:$0xff]  }
 0x196   :  { %456 = vrot.lane.b32.xlu0 %v433_v10, %s2148_s27  ;;  %v500_v42 = vsel %vm476_vm11, %v498_v37, %v499_v38  ;;  %1883 = vmatpush3.bf16.msra.mxu0 %v2117_v48  ;;  %v2126_v37 = vld [vmem:[%s2807_s4 + $0x20] sm:$0xff]   ;;  %v2127_v38 = vld [vmem:[%s2807_s4 + $0x68] sm:$0xff]   ;;  %v2133_v48 = vld [vmem:[%s2807_s4 + $0x78] sm:$0xff]  }
 0x197   :  { %1884 = vmatprep.subr.bf16.mxu0 %v2118_v50  ;;  %v2134_v50 = vld [vmem:[%s2807_s4 + $0xb0] sm:$0xff]  }
 0x199   :  { %604 = vrot.lane.b32.xlu1 %v589_v35, %s2149_s28  ;;  %v2124_v35 = vld [vmem:[%s2807_s4 + $0x60] sm:$0xff]  }
 0x19a   :  { %602 = vrot.lane.b32.xlu0 %v580_v36, %s2149_s28  ;;  %v2125_v36 = vld [vmem:[%s2807_s4 + $0x98] sm:$0xff]  }
 0x19e   :  { %515 = vrot.lane.b32.xlu0 %v500_v42, %s2147_s2  ;;  %v2128_v42 = vld [vmem:[%s2807_s4 + $0xa0] sm:$0xff]  }
 0x1dc   :  { %v502_v51 = vpop.permute.xlu1 %501 }
 0x1e0   :  { %v447_v52 = vpop.permute.xlu1 %446 }
 0x1e1   :  { %v445_v43 = vpop.permute.xlu0 %444 }
 0x1e2   :  { %v633_v39 = vsel %vm631_vm10, %v2317_v3, %v445_v43  ;;  %v635_v3 = vsel %vm631_vm10, %v2307_v61, %v447_v52  ;;  %v2136_v43 = vld [vmem:[%s2807_s4 + $0xb8] sm:$0xff]   ;;  %v2615_v52 = vld [vmem:[%s2808_s6] sm:$0xff]  }
 0x1e3   :  { %v650_v58 = vsel %vm648_vm14, %v633_v39, %v502_v51  ;;  %v2135_v51 = vld [vmem:[%s2807_s4 + $0x38] sm:$0xff]   ;;  %v2622_v39 = vld [vmem:[%s2809_s3] ss:$0 sm:$0xff] }
 0x1e4   :  { %v593_v63 = vpop.permute.xlu1 %592 }
 0x1e5   :  { %v591_v56 = vpop.permute.xlu0 %590 }
 0x1e6   :  { %v667_v60 = vsel %vm665_vm15, %v650_v58, %v591_v56 }
 0x1e7   :  { %834 = vmatmul.mubr.bf16.vlgmr.msra.gmra.mrb[0].mxu1 %v667_v60 }
 0x1e8   :  { %1823 = vmatprep.mubr.msk.bf16.mxu1 %vm631_vm10, %v612_v18  ;;  %2009 = vmatpush3.bf16.msra.mxu1 %v2115_v47  ;;  %v2131_v47 = vld [vmem:[%s2807_s4 + $0xa8] sm:$0xff]  }
 0x1e9   :  { %v504_v33 = vpop.permute.xlu0 %503  ;;  %2010 = vmatprep.subr.bf16.mxu1 %v2119_v59  ;;  %v506_v2 = vpop.permute.xlu1 %505 }
 0x1ea   :  { %v652_v1 = vsel %vm648_vm14, %v635_v3, %v504_v33 }
 0x1eb   :  { %v670_v0 = vsel %vm665_vm15, %v652_v1, %v593_v63 }
 0x1ec   :  { %2011 = vmatpush3.bf16.msra.mxu1 %v2119_v59 }
 0x1ed   :  { %v451_v7 = vpop.permute.xlu1 %450 }
 0x1ee   :  { %v639_v14 = vsel %vm631_vm10, %v2339_v45, %v451_v7 }
 0x1ef   :  { %v449_v4 = vpop.permute.xlu0 %448  ;;  %842 = vmatmul.mubr.bf16.gmra.mrb[4].mxu1 %v670_v0 }
 0x1f0   :  { %1824 = vmatprep.mubr.msk.bf16.mxu1 %vm631_vm10, %v2458_v22  ;;  %v637_v6 = vsel %vm631_vm10, %v2342_v49, %v449_v4 }
 0x1f1   :  { %v654_v9 = vsel %vm648_vm14, %v637_v6, %v506_v2 }
 0x1f3   :  { %v597_v13 = vpop.permute.xlu1 %596 }
 0x1f4   :  { %v595_v8 = vpop.permute.xlu0 %594 }
 0x1f5   :  { %v673_v61 = vsel %vm665_vm15, %v654_v9, %v595_v8  ;;  %v2140_v8 = vld [vmem:[%s2808_s6 + $0x18] sm:$0xff]  }
 0x1f7   :  { %850 = vmatmul.mubr.bf16.gmra.mrb[8].mxu1 %v673_v61  ;;  %v510_v17 = vpop.permute.xlu1 %509 }
 0x1f8   :  { %v508_v11 = vpop.permute.xlu0 %507  ;;  %1825 = vmatprep.mubr.msk.bf16.mxu1 %vm631_vm10, %v2463_v24 }
 0x1f9   :  { %v656_v15 = vsel %vm648_vm14, %v639_v14, %v508_v11 }
 0x1fa   :  { %v676_v49 = vsel %vm665_vm15, %v656_v15, %v597_v13 }
 0x1fb   :  { %v455_v21 = vpop.permute.xlu1 %454 }
 0x1fc   :  { %v453_v16 = vpop.permute.xlu0 %452  ;;  %v643_v25 = vsel %vm631_vm10, %v2368_v19, %v455_v21 }
 0x1fd   :  { %v641_v20 = vsel %vm631_vm10, %v2374_v23, %v453_v16 }
 0x1fe   :  { %v658_v22 = vsel %vm648_vm14, %v641_v20, %v510_v17 }
 0x1ff   :  { %858 = vmatmul.mubr.bf16.gmra.mrb[12].mxu1 %v676_v49  ;;  %v601_v62 = vpop.permute.xlu1 %600 }
 0x200   :  { %v599_v18 = vpop.permute.xlu0 %598  ;;  %1826 = vmatprep.mubr.msk.bf16.mxu1 %vm631_vm10, %v2469_v27 }
 0x201   :  { %v679_v45 = vsel %vm665_vm15, %v658_v22, %v599_v18 }
 0x203   :  { %v514_v23 = vpop.permute.xlu1 %513 }
 0x204   :  { %v512_v24 = vpop.permute.xlu0 %511 }
 0x205   :  { %v660_v55 = vsel %vm648_vm14, %v643_v25, %v512_v24 }
 0x206   :  { %v682_v27 = vsel %vm665_vm15, %v660_v55, %v601_v62 }
 0x207   :  { %866 = vmatmul.mubr.bf16.gmra.mrb[16].mxu1 %v679_v45  ;;  %v459_v19 = vpop.permute.xlu1 %458 }
 0x208   :  { %1827 = vmatprep.mubr.msk.bf16.mxu1 %vm631_vm10, %v2474_v57  ;;  %v457_v26 = vpop.permute.xlu0 %456  ;;  %v647_v32 = vsel %vm631_vm10, %v2396_v53, %v459_v19  ;;  %v2123_v53 = vld [vmem:[%s2807_s4 + $0x18] sm:$0xff]  }
 0x209   :  { %v645_v41 = vsel %vm631_vm10, %v2411_v12, %v457_v26  ;;  %v2120_v12 = vld [vmem:[%s2807_s4 + $0x10] sm:$0xff]  }
 0x20a   :  { %v662_v57 = vsel %vm648_vm14, %v645_v41, %v514_v23  ;;  %1885 = vmatpush3.bf16.msra.mxu0 %v2120_v12 }
 0x20b   :  { %v605_v10 = vpop.permute.xlu1 %604  ;;  %1886 = vmatprep.subr.bf16.mxu0 %v2121_v34 }
 0x20c   :  { %v603_v28 = vpop.permute.xlu0 %602 }
 0x20d   :  { %v685_v29 = vsel %vm665_vm15, %v662_v57, %v603_v28 }
 0x20e   :  { %1887 = vmatpush3.bf16.msra.mxu0 %v2123_v53  ;;  %v2138_v53 = vld [vmem:[%s2808_s6 + $0x8] sm:$0xff]  }
 0x20f   :  { %874 = vmatmul.mubr.bf16.gmra.mrb[20].mxu1 %v682_v27  ;;  %1888 = vmatprep.subr.bf16.mxu0 %v2124_v35 }
 0x210   :  { %1828 = vmatprep.mubr.msk.bf16.mxu1 %vm631_vm10, %v2478_v5  ;;  %v516_v30 = vpop.permute.xlu0 %515 }
 0x211   :  { %v664_v5 = vsel %vm648_vm14, %v647_v32, %v516_v30 }
 0x212   :  { %v688_v40 = vsel %vm665_vm15, %v664_v5, %v605_v10  ;;  %1889 = vmatpush3.bf16.msra.mxu0 %v2126_v37 }
 0x213   :  { %1890 = vmatprep.subr.bf16.mxu0 %v2127_v38 }
 0x216   :  { %1891 = vmatpush3.bf16.msra.mxu0 %v2129_v44 }
 0x217   :  { %882 = vmatmul.mubr.bf16.gmra.mrb[24].mxu1 %v685_v29  ;;  %1892 = vmatprep.subr.bf16.mxu0 %v2130_v46 }
 0x218   :  { %1829 = vmatprep.mubr.msk.bf16.mxu1 %vm631_vm10, %v2481_v31  ;;  %v2122_v31 = vld [vmem:[%s2807_s4 + $0x90] sm:$0xff]  }
 0x219   :  { %2012 = vmatprep.subr.bf16.mxu1 %v2122_v31 }
 0x21a   :  { %2013 = vmatpush3.bf16.msra.mxu1 %v2122_v31  ;;  %1893 = vmatpush3.bf16.msra.mxu0 %v2132_v54 }
 0x21b   :  { %2014 = vmatprep.subr.bf16.mxu1 %v2125_v36  ;;  %1894 = vmatprep.subr.bf16.mxu0 %v2133_v48 }
 0x21e   :  { %2015 = vmatpush3.bf16.msra.mxu1 %v2125_v36  ;;  %1895 = vmatpush3.bf16.msra.mxu0 %v2135_v51 }
 0x21f   :  { %890 = vmatmul.mubr.bf16.gmra.mrb[28].mxu1 %v688_v40  ;;  %2016 = vmatprep.subr.bf16.mxu1 %v2128_v42 }
 0x220   :  { %2040 = vmatprep.subr.bf16.mxu0 %v2615_v52 }
 0x222   :  { %2017 = vmatpush3.bf16.msra.mxu1 %v2128_v42 }
 0x223   :  { %2018 = vmatprep.subr.bf16.mxu1 %v2131_v47 }
 0x226   :  { %2019 = vmatpush3.bf16.msra.mxu1 %v2131_v47 }
 0x227   :  { %2020 = vmatprep.subr.bf16.mxu1 %v2134_v50 }
 0x22a   :  { %2021 = vmatpush3.bf16.msra.mxu1 %v2134_v50 }
 0x22b   :  { %2022 = vmatprep.subr.bf16.mxu1 %v2136_v43 }
 0x22e   :  { %2023 = vmatpush3.bf16.msra.mxu1 %v2136_v43 }
 0x22f   :  { %2072 = vmatprep.subr.bf16.mxu1 %v2615_v52 }
 0x2ba   :  { %v835_v56 = vpop.f32.mrb[0].mxu1 }
 0x2bb   :  { %v836_v58 = vadd.f32 %v2622_v39, %v835_v56  ;;  %v837_v59 = vpop.f32.mrb[1].mxu1 }
 0x2bc   :  { %v838_v60 = vpop.f32.mrb[2].mxu1 }
 0x2bd   :  { %v839_v63 = vadd.f32 %v2622_v39, %v838_v60  ;;  %v840_v33 = vpop.f32.mrb[3].mxu1  ;;  %v898_v3 = vmax.f32 %v836_v58, 0.0  ;;  %v2139_v58 = vld [vmem:[%s2808_s6 + $0x10] sm:$0xff]  }
 0x2bf   :  { %v899_v1 = vmax.f32 %v839_v63, 0.0 }
 0x2c1   :  { %v914_v2 = vpack.c.bf16 %v899_v1, %v898_v3 }
 0x2c2   :  { %v843_v0 = vpop.f32.mrb[4].mxu1 }
 0x2c3   :  { %v923_v4 = vshrl.u32 %v914_v2, 16  ;;  %v844_v6 = vadd.f32 %v2622_v39, %v843_v0  ;;  %v845_v7 = vpop.f32.mrb[5].mxu1  ;;  %v926_v11 = vshll.u32 %v914_v2, 16 }
 0x2c4   :  { %v846_v9 = vpop.f32.mrb[6].mxu1 }
 0x2c5   :  { %v925_v61 = vrot.slane %v923_v4, 7  ;;  %v847_v13 = vadd.f32 %v2622_v39, %v846_v9  ;;  %v848_v14 = vpop.f32.mrb[7].mxu1  ;;  %v900_v16 = vmax.f32 %v844_v6, 0.0 }
 0x2c7   :  { %v928_v15 = vor.u32 %v926_v11, %v925_v61  ;;  %v901_v49 = vmax.f32 %v847_v13, 0.0  ;;  %v1005_v17 = vsel %vm2628_vm1, %v925_v61, 0 }
 0x2c8   :  { %v1134_v24 = vrot.slane %v1005_v17, 1  ;;  %v1021_v25 = vshll.u32 %v1005_v17, 16 }
 0x2c9   :  { %v997_v18 = vsel %vm2628_vm1, 0, %v928_v15  ;;  %v915_v20 = vpack.c.bf16 %v901_v49, %v900_v16 }
 0x2ca   :  { %v851_v21 = vpop.f32.mrb[8].mxu1  ;;  %v1133_v22 = vrot.slane %v997_v18, 1  ;;  %v1016_v45 = vshll.u32 %v997_v18, 16  ;;  %v1014_v41 = vshrl.u32 %v997_v18, 16  ;;  %v1023_v5 = vrot.slane %v1021_v25, 1 }
 0x2cb   :  { %v930_v62 = vshrl.u32 %v915_v20, 16  ;;  %v852_v55 = vadd.f32 %v2622_v39, %v851_v21  ;;  %v853_v26 = vpop.f32.mrb[9].mxu1  ;;  %v933_v29 = vshll.u32 %v915_v20, 16 }
 0x2cc   :  { %v854_v27 = vpop.f32.mrb[10].mxu1  ;;  %v1135_v23 = vsel %vm476_vm11, %v1133_v22, %v1134_v24  ;;  %v1018_v28 = vrot.slane %v1016_v45, 1 }
 0x2cd   :  { %v932_v57 = vrot.slane %v930_v62, 7  ;;  %v855_v19 = vadd.f32 %v2622_v39, %v854_v27  ;;  %v856_v30 = vpop.f32.mrb[11].mxu1  ;;  %2024 = vmatprep.mubr.bf16.mxu1 %v1135_v23  ;;  %v902_v12 = vmax.f32 %v852_v55, 0.0 }
 0x2ce   :  { %v1019_v32 = vor.u32 %v1018_v28, %v1014_v41 }
 0x2cf   :  { %v935_v10 = vor.u32 %v933_v29, %v932_v57  ;;  %v1006_v40 = vsel %vm2628_vm1, %v932_v57, 0  ;;  %v903_v34 = vmax.f32 %v855_v19, 0.0 }
 0x2d0   :  { %v1024_v31 = vsel %vm363_vm12, %v1019_v32, %v1023_v5  ;;  %v1137_v37 = vrot.slane %v1006_v40, 1  ;;  %v1033_v46 = vshll.u32 %v1006_v40, 16 }
 0x2d1   :  { %v998_v35 = vsel %vm2628_vm1, 0, %v935_v10  ;;  %v916_v36 = vpack.c.bf16 %v903_v34, %v902_v12  ;;  %1396 = vmatprep.mubr.bf16.mxu0 %v1024_v31 }
 0x2d2   :  { %v859_v38 = vpop.f32.mrb[12].mxu1  ;;  %1397 = vmatmul.mubr.bf16.vlgmr.msra.gmra.mrb[16].mxu0 %v997_v18  ;;  %v1136_v42 = vrot.slane %v998_v35, 1  ;;  %v1028_v44 = vshll.u32 %v998_v35, 16  ;;  %v1026_v43 = vshrl.u32 %v998_v35, 16  ;;  %v1035_v1 = vrot.slane %v1033_v46, 1 }
 0x2d3   :  { %v937_v47 = vshrl.u32 %v916_v36, 16  ;;  %v860_v54 = vadd.f32 %v2622_v39, %v859_v38  ;;  %v861_v48 = vpop.f32.mrb[13].mxu1  ;;  %2041 = vmatpush3.bf16.msra.mxu0 %v2615_v52  ;;  %v940_v60 = vshll.u32 %v916_v36, 16 }
 0x2d4   :  { %v862_v50 = vpop.f32.mrb[14].mxu1  ;;  %v1138_v51 = vsel %vm476_vm11, %v1136_v42, %v1137_v37  ;;  %v1030_v56 = vrot.slane %v1028_v44, 1  ;;  %2042 = vmatprep.subr.bf16.mxu0 %v2138_v53 }
 0x2d5   :  { %v939_v59 = vrot.slane %v937_v47, 7  ;;  %v863_v63 = vadd.f32 %v2622_v39, %v862_v50  ;;  %v864_v33 = vpop.f32.mrb[15].mxu1  ;;  %2025 = vmatmul.mubr.bf16.vlgmr.msra.gmra.mrb[32].mxu1 %v1138_v51  ;;  %v904_v0 = vmax.f32 %v860_v54, 0.0 }
 0x2d6   :  { %v1031_v3 = vor.u32 %v1030_v56, %v1026_v43  ;;  %2080 = vmatpush3.bf16.msra.mxu1 %v2615_v52 }
 0x2d7   :  { %v942_v2 = vor.u32 %v940_v60, %v939_v59  ;;  %v905_v4 = vmax.f32 %v863_v63, 0.0  ;;  %v1007_v6 = vsel %vm2628_vm1, %v939_v59, 0  ;;  %2043 = vmatpush3.bf16.msra.mxu0 %v2138_v53  ;;  %2073 = vmatprep.subr.bf16.mxu1 %v2138_v53 }
 0x2d8   :  { %v1036_v7 = vsel %vm363_vm12, %v1031_v3, %v1035_v1  ;;  %2044 = vmatprep.subr.bf16.mxu0 %v2139_v58  ;;  %v1140_v52 = vrot.slane %v1007_v6, 1  ;;  %v1045_v15 = vshll.u32 %v1007_v6, 16 }
 0x2d9   :  { %v999_v9 = vsel %vm2628_vm1, 0, %v942_v2  ;;  %v917_v61 = vpack.c.bf16 %v905_v4, %v904_v0  ;;  %1404 = vmatprep.mubr.bf16.mxu0 %v1036_v7 }
 0x2da   :  { %v867_v11 = vpop.f32.mrb[16].mxu1  ;;  %1405 = vmatmul.mubr.bf16.gmra.mrb[20].mxu0 %v998_v35  ;;  %v1139_v13 = vrot.slane %v999_v9, 1  ;;  %v1040_v14 = vshll.u32 %v999_v9, 16  ;;  %2081 = vmatpush3.bf16.msra.mxu1 %v2138_v53  ;;  %v1038_v21 = vshrl.u32 %v999_v9, 16  ;;  %v1047_v26 = vrot.slane %v1045_v15, 1 }
 0x2db   :  { %v944_v16 = vshrl.u32 %v917_v61, 16  ;;  %v868_v49 = vadd.f32 %v2622_v39, %v867_v11  ;;  %v869_v17 = vpop.f32.mrb[17].mxu1  ;;  %2045 = vmatpush3.bf16.msra.mxu0 %v2139_v58  ;;  %2074 = vmatprep.subr.bf16.mxu1 %v2139_v58  ;;  %v947_v45 = vshll.u32 %v917_v61, 16 }
 0x2dc   :  { %v870_v18 = vpop.f32.mrb[18].mxu1  ;;  %v1141_v20 = vsel %vm476_vm11, %v1139_v13, %v1140_v52  ;;  %v1042_v22 = vrot.slane %v1040_v14, 1  ;;  %2046 = vmatprep.subr.bf16.mxu0 %v2140_v8 }
 0x2dd   :  { %v946_v24 = vrot.slane %v944_v16, 7  ;;  %v871_v25 = vadd.f32 %v2622_v39, %v870_v18  ;;  %v872_v62 = vpop.f32.mrb[19].mxu1  ;;  %2028 = vmatprep.mubr.bf16.mxu1 %v1141_v20  ;;  %v906_v23 = vmax.f32 %v868_v49, 0.0 }
 0x2de   :  { %v1043_v55 = vor.u32 %v1042_v22, %v1038_v21  ;;  %2082 = vmatpush3.bf16.msra.mxu1 %v2139_v58 }
 0x2df   :  { %v949_v27 = vor.u32 %v947_v45, %v946_v24  ;;  %v907_v41 = vmax.f32 %v871_v25, 0.0  ;;  %v1008_v28 = vsel %vm2628_vm1, %v946_v24, 0  ;;  %2075 = vmatprep.subr.bf16.mxu1 %v2140_v8  ;;  %2047 = vmatpush3.bf16.msra.mxu0 %v2140_v8 }
 0x2e0   :  { %v1048_v57 = vsel %vm363_vm12, %v1043_v55, %v1047_v26  ;;  %v1143_v5 = vrot.slane %v1008_v28, 1  ;;  %v1057_v40 = vshll.u32 %v1008_v28, 16 }
 0x2e1   :  { %v1000_v29 = vsel %vm2628_vm1, 0, %v949_v27  ;;  %v918_v19 = vpack.c.bf16 %v907_v41, %v906_v23  ;;  %1412 = vmatprep.mubr.bf16.mxu0 %v1048_v57 }
 0x2e2   :  { %v875_v30 = vpop.f32.mrb[20].mxu1  ;;  %1413 = vmatmul.mubr.bf16.gmra.mrb[24].mxu0 %v999_v9  ;;  %v1142_v32 = vrot.slane %v1000_v29, 1  ;;  %v1052_v10 = vshll.u32 %v1000_v29, 16  ;;  %v1050_v36 = vshrl.u32 %v1000_v29, 16  ;;  %v1059_v54 = vrot.slane %v1057_v40, 1  ;;  %2083 = vmatpush3.bf16.msra.mxu1 %v2140_v8 }
 0x2e3   :  { %v951_v12 = vshrl.u32 %v918_v19, 16  ;;  %v876_v34 = vadd.f32 %v2622_v39, %v875_v30  ;;  %v877_v31 = vpop.f32.mrb[21].mxu1  ;;  %v954_v42 = vshll.u32 %v918_v19, 16 }
 0x2e4   :  { %v878_v53 = vpop.f32.mrb[22].mxu1  ;;  %v1144_v35 = vsel %vm476_vm11, %v1142_v32, %v1143_v5  ;;  %v1054_v37 = vrot.slane %v1052_v10, 1 }
 0x2e5   :  { %v953_v38 = vrot.slane %v951_v12, 7  ;;  %v879_v44 = vadd.f32 %v2622_v39, %v878_v53  ;;  %v880_v46 = vpop.f32.mrb[23].mxu1  ;;  %2029 = vmatmul.mubr.bf16.gmra.mrb[36].mxu1 %v1144_v35  ;;  %v908_v50 = vmax.f32 %v876_v34, 0.0 }
 0x2e6   :  { %v1055_v47 = vor.u32 %v1054_v37, %v1050_v36 }
 0x2e7   :  { %v956_v48 = vor.u32 %v954_v42, %v953_v38  ;;  %v909_v51 = vmax.f32 %v879_v44, 0.0  ;;  %v1009_v43 = vsel %vm2628_vm1, %v953_v38, 0 }
 0x2e8   :  { %v1060_v56 = vsel %vm363_vm12, %v1055_v47, %v1059_v54  ;;  %v1146_v33 = vrot.slane %v1009_v43, 1  ;;  %v1069_v1 = vshll.u32 %v1009_v43, 16 }
 0x2e9   :  { %v1001_v58 = vsel %vm2628_vm1, 0, %v956_v48  ;;  %v919_v59 = vpack.c.bf16 %v909_v51, %v908_v50  ;;  %1420 = vmatprep.mubr.bf16.mxu0 %v1060_v56 }
 0x2ea   :  { %v883_v60 = vpop.f32.mrb[24].mxu1  ;;  %1421 = vmatmul.mubr.bf16.gmra.mrb[28].mxu0 %v1000_v29  ;;  %v1145_v63 = vrot.slane %v1001_v58, 1  ;;  %v1064_v3 = vshll.u32 %v1001_v58, 16  ;;  %v1062_v9 = vshrl.u32 %v1001_v58, 16  ;;  %v1071_v16 = vrot.slane %v1069_v1, 1 }
 0x2eb   :  { %v958_v2 = vshrl.u32 %v919_v59, 16  ;;  %v884_v0 = vadd.f32 %v2622_v39, %v883_v60  ;;  %v885_v4 = vpop.f32.mrb[25].mxu1  ;;  %v961_v13 = vshll.u32 %v919_v59, 16 }
 0x2ec   :  { %v886_v6 = vpop.f32.mrb[26].mxu1  ;;  %v1147_v7 = vsel %vm476_vm11, %v1145_v63, %v1146_v33  ;;  %v1066_v61 = vrot.slane %v1064_v3, 1 }
 0x2ed   :  { %v960_v11 = vrot.slane %v958_v2, 7  ;;  %v887_v52 = vadd.f32 %v2622_v39, %v886_v6  ;;  %v888_v14 = vpop.f32.mrb[27].mxu1  ;;  %2032 = vmatprep.mubr.bf16.mxu1 %v1147_v7  ;;  %v910_v17 = vmax.f32 %v884_v0, 0.0 }
 0x2ee   :  { %v1067_v15 = vor.u32 %v1066_v61, %v1062_v9  ;;  %v2143_v14 = vld [vmem:[%s2808_s6 + $0x30] sm:$0xff]  }
 0x2ef   :  { %v963_v49 = vor.u32 %v961_v13, %v960_v11  ;;  %v911_v18 = vmax.f32 %v887_v52, 0.0  ;;  %v1010_v20 = vsel %vm2628_vm1, %v960_v11, 0  ;;  %v2141_v13 = vld [vmem:[%s2808_s6 + $0x20] sm:$0xff]   ;;  %v2142_v52 = vld [vmem:[%s2808_s6 + $0x28] sm:$0xff]  }
 0x2f0   :  { %v1072_v21 = vsel %vm363_vm12, %v1067_v15, %v1071_v16  ;;  %v1149_v62 = vrot.slane %v1010_v20, 1  ;;  %v1081_v26 = vshll.u32 %v1010_v20, 16  ;;  %2048 = vmatprep.subr.bf16.mxu0 %v2141_v13  ;;  %2076 = vmatprep.subr.bf16.mxu1 %v2141_v13  ;;  %v2144_v15 = vld [vmem:[%s2808_s6 + $0x38] sm:$0xff]  }
 0x2f1   :  { %v1002_v22 = vsel %vm2628_vm1, 0, %v963_v49  ;;  %v920_v24 = vpack.c.bf16 %v911_v18, %v910_v17  ;;  %1428 = vmatprep.mubr.bf16.mxu0 %v1072_v21  ;;  %2049 = vmatpush3.bf16.msra.mxu0 %v2141_v13  ;;  %v2719_v17 = vld [vmem:[%s2810_s5] ss:$0 sm:$0xff] }
 0x2f2   :  { %v891_v45 = vpop.f32.mrb[28].mxu1  ;;  %1429 = vmatmul.mubr.bf16.gmra.mrb[32].mxu0 %v1001_v58  ;;  %v1148_v25 = vrot.slane %v1002_v22, 1  ;;  %v1076_v55 = vshll.u32 %v1002_v22, 16  ;;  %v1074_v29 = vshrl.u32 %v1002_v22, 16  ;;  %v1083_v12 = vrot.slane %v1081_v26, 1  ;;  %2084 = vmatpush3.bf16.msra.mxu1 %v2141_v13 }
 0x2f3   :  { %v965_v27 = vshrl.u32 %v920_v24, 16  ;;  %v892_v23 = vadd.f32 %v2622_v39, %v891_v45  ;;  %v893_v41 = vpop.f32.mrb[29].mxu1  ;;  %v968_v32 = vshll.u32 %v920_v24, 16  ;;  %2050 = vmatprep.subr.bf16.mxu0 %v2142_v52  ;;  %2077 = vmatprep.subr.bf16.mxu1 %v2142_v52 }
 0x2f4   :  { %v894_v28 = vpop.f32.mrb[30].mxu1  ;;  %v1150_v57 = vsel %vm476_vm11, %v1148_v25, %v1149_v62  ;;  %v1078_v19 = vrot.slane %v1076_v55, 1 }
 0x2f5   :  { %v967_v30 = vrot.slane %v965_v27, 7  ;;  %v895_v5 = vadd.f32 %v2622_v39, %v894_v28  ;;  %v896_v10 = vpop.f32.mrb[31].mxu1  ;;  %2033 = vmatmul.mubr.bf16.gmra.mrb[40].mxu1 %v1150_v57  ;;  %v912_v31 = vmax.f32 %v892_v23, 0.0  ;;  %2051 = vmatpush3.bf16.msra.mxu0 %v2142_v52 }
 0x2f6   :  { %v1079_v40 = vor.u32 %v1078_v19, %v1074_v29  ;;  %2085 = vmatpush3.bf16.msra.mxu1 %v2142_v52  ;;  %2052 = vmatprep.subr.bf16.mxu0 %v2143_v14 }
 0x2f7   :  { %v970_v34 = vor.u32 %v968_v32, %v967_v30  ;;  %v913_v53 = vmax.f32 %v895_v5, 0.0  ;;  %v1011_v35 = vsel %vm2628_vm1, %v967_v30, 0  ;;  %2078 = vmatprep.subr.bf16.mxu1 %v2143_v14 }
 0x2f8   :  { %v1084_v36 = vsel %vm363_vm12, %v1079_v40, %v1083_v12  ;;  %v1152_v39 = vrot.slane %v1011_v35, 1  ;;  %v1093_v46 = vshll.u32 %v1011_v35, 16 }
 0x2f9   :  { %v1003_v37 = vsel %vm2628_vm1, 0, %v970_v34  ;;  %v921_v38 = vpack.c.bf16 %v913_v53, %v912_v31  ;;  %1436 = vmatprep.mubr.bf16.mxu0 %v1084_v36  ;;  %2053 = vmatpush3.bf16.msra.mxu0 %v2143_v14 }
 0x2fa   :  { %1437 = vmatmul.mubr.bf16.gmra.mrb[36].mxu0 %v1002_v22  ;;  %v1151_v42 = vrot.slane %v1003_v37, 1  ;;  %v1088_v44 = vshll.u32 %v1003_v37, 16  ;;  %v1086_v48 = vshrl.u32 %v1003_v37, 16  ;;  %v1095_v58 = vrot.slane %v1093_v46, 1  ;;  %2086 = vmatpush3.bf16.msra.mxu1 %v2143_v14 }
 0x2fb   :  { %v972_v47 = vshrl.u32 %v921_v38, 16  ;;  %v975_v43 = vshll.u32 %v921_v38, 16  ;;  %2054 = vmatprep.subr.bf16.mxu0 %v2144_v15  ;;  %2079 = vmatprep.subr.bf16.mxu1 %v2144_v15 }
 0x2fc   :  { %v1153_v54 = vsel %vm476_vm11, %v1151_v42, %v1152_v39  ;;  %v1090_v50 = vrot.slane %v1088_v44, 1 }
 0x2fd   :  { %v974_v51 = vrot.slane %v972_v47, 7  ;;  %2036 = vmatprep.mubr.bf16.mxu1 %v1153_v54  ;;  %2055 = vmatpush3.bf16.msra.mxu0 %v2144_v15 }
 0x2fe   :  { %v1091_v56 = vor.u32 %v1090_v50, %v1086_v48  ;;  %2087 = vmatpush3.bf16.msra.mxu1 %v2144_v15 }
 0x2ff   :  { %v977_v59 = vor.u32 %v975_v43, %v974_v51  ;;  %v1012_v60 = vsel %vm2628_vm1, %v974_v51, 0 }
 0x300   :  { %v1096_v63 = vsel %vm363_vm12, %v1091_v56, %v1095_v58  ;;  %v1155_v1 = vrot.slane %v1012_v60, 1  ;;  %v1105_v0 = vshll.u32 %v1012_v60, 16 }
 0x301   :  { %v1004_v33 = vsel %vm2628_vm1, 0, %v977_v59  ;;  %1444 = vmatprep.mubr.bf16.mxu0 %v1096_v63 }
 0x302   :  { %1445 = vmatmul.mubr.bf16.gmra.mrb[40].mxu0 %v1003_v37  ;;  %v1154_v3 = vrot.slane %v1004_v33, 1  ;;  %v1100_v2 = vshll.u32 %v1004_v33, 16  ;;  %v1098_v6 = vshrl.u32 %v1004_v33, 16  ;;  %v1107_v61 = vrot.slane %v1105_v0, 1 }
 0x304   :  { %v1156_v4 = vsel %vm476_vm11, %v1154_v3, %v1155_v1  ;;  %v1102_v7 = vrot.slane %v1100_v2, 1 }
 0x305   :  { %2037 = vmatmul.mubr.bf16.gmra.mrb[44].mxu1 %v1156_v4 }
 0x306   :  { %v1103_v9 = vor.u32 %v1102_v7, %v1098_v6 }
 0x308   :  { %v1108_v11 = vsel %vm363_vm12, %v1103_v9, %v1107_v61 }
 0x309   :  { %1452 = vmatprep.mubr.bf16.mxu0 %v1108_v11 }
 0x30a   :  { %1453 = vmatmul.mubr.bf16.gmra.mrb[44].mxu0 %v1004_v33 }
 0x3a5   :  { %v1896_v16 = vpop.f32.mrb[16].mxu0 }
 0x3a6   :  { %v1897_v49 = vpop.f32.mrb[17].mxu0 }
 0x3a7   :  { %v1898_v18 = vadd.f32 %v1897_v49, %v1896_v16  ;;  %v1899_v20 = vpop.f32.mrb[18].mxu0 }
 0x3a8   :  { %v1900_v21 = vpop.f32.mrb[19].mxu0  ;;  %v2026_v22 = vpop.f32.mrb[32].mxu1 }
 0x3a9   :  { %v1901_v24 = vadd.f32 %v1900_v21, %v1899_v20  ;;  %v1399_v45 = vadd.f32 %v1898_v18, %v2719_v17  ;;  %v1495_v25 = vpop.f32.mrb[33].mxu1 }
 0x3aa   :  { %v2027_v62 = vpop.f32.mrb[34].mxu1 }
 0x3ab   :  { %v1496_v55 = vadd.f32 %v1495_v25, %v1399_v45  ;;  %v1402_v26 = vadd.f32 %v1901_v24, %v2719_v17  ;;  %v1498_v27 = vpop.f32.mrb[35].mxu1 }
 0x3ad   :  { %v1499_v23 = vadd.f32 %v1498_v27, %v1402_v26  ;;  %v1902_v41 = vpop.f32.mrb[20].mxu0  ;;  %v1558_v57 = vmax.f32 %v1496_v55, 0.0 }
 0x3ae   :  { %v1903_v28 = vpop.f32.mrb[21].mxu0 }
 0x3af   :  { %v1559_v29 = vmax.f32 %v1499_v23, 0.0  ;;  %v1904_v19 = vadd.f32 %v1903_v28, %v1902_v41  ;;  %v1905_v30 = vpop.f32.mrb[22].mxu0 }
 0x3b0   :  { %v1906_v32 = vpop.f32.mrb[23].mxu0 }
 0x3b1   :  { %v1574_v5 = vpack.c.bf16 %v1559_v29, %v1558_v57  ;;  %v1407_v10 = vadd.f32 %v1904_v19, %v2719_v17  ;;  %v1907_v40 = vadd.f32 %v1906_v32, %v1905_v30 }
 0x3b3   :  { %v1504_v12 = vadd.f32 %v2026_v22, %v1407_v10  ;;  %v1410_v34 = vadd.f32 %v1907_v40, %v2719_v17  ;;  %2056 = vmatprep.mubr.bf16.mxu0 %v1574_v5 }
 0x3b5   :  { %v1507_v31 = vadd.f32 %v2027_v62, %v1410_v34  ;;  %v1908_v53 = vpop.f32.mrb[24].mxu0  ;;  %v1560_v36 = vmax.f32 %v1504_v12, 0.0 }
 0x3b6   :  { %v1909_v35 = vpop.f32.mrb[25].mxu0 }
 0x3b7   :  { %v1561_v37 = vmax.f32 %v1507_v31, 0.0  ;;  %v1910_v38 = vadd.f32 %v1909_v35, %v1908_v53  ;;  %v1911_v42 = vpop.f32.mrb[26].mxu0 }
 0x3b8   :  { %v1912_v39 = vpop.f32.mrb[27].mxu0  ;;  %v2030_v44 = vpop.f32.mrb[36].mxu1 }
 0x3b9   :  { %v1575_v46 = vpack.c.bf16 %v1561_v37, %v1560_v36  ;;  %v1913_v47 = vadd.f32 %v1912_v39, %v1911_v42  ;;  %v1415_v54 = vadd.f32 %v1910_v38, %v2719_v17  ;;  %v1511_v48 = vpop.f32.mrb[37].mxu1 }
 0x3ba   :  { %v2031_v50 = vpop.f32.mrb[38].mxu1 }
 0x3bb   :  { %v1512_v51 = vadd.f32 %v1511_v48, %v1415_v54  ;;  %v1418_v43 = vadd.f32 %v1913_v47, %v2719_v17  ;;  %v1514_v56 = vpop.f32.mrb[39].mxu1  ;;  %2057 = vmatmul.mubr.bf16.vlgmr.msra.gmra.mrb[48].mxu0 %v1575_v46 }
 0x3bd   :  { %v1515_v58 = vadd.f32 %v1514_v56, %v1418_v43  ;;  %v1914_v59 = vpop.f32.mrb[28].mxu0  ;;  %v1562_v63 = vmax.f32 %v1512_v51, 0.0 }
 0x3be   :  { %v1915_v60 = vpop.f32.mrb[29].mxu0 }
 0x3bf   :  { %v1563_v33 = vmax.f32 %v1515_v58, 0.0  ;;  %v1916_v3 = vadd.f32 %v1915_v60, %v1914_v59  ;;  %v1917_v1 = vpop.f32.mrb[30].mxu0 }
 0x3c0   :  { %v1918_v2 = vpop.f32.mrb[31].mxu0 }
 0x3c1   :  { %v1576_v0 = vpack.c.bf16 %v1563_v33, %v1562_v63  ;;  %v1423_v4 = vadd.f32 %v1916_v3, %v2719_v17  ;;  %v1919_v6 = vadd.f32 %v1918_v2, %v1917_v1 }
 0x3c3   :  { %v1520_v7 = vadd.f32 %v2030_v44, %v1423_v4  ;;  %v1426_v9 = vadd.f32 %v1919_v6, %v2719_v17  ;;  %2060 = vmatprep.mubr.bf16.mxu0 %v1576_v0 }
 0x3c5   :  { %v1523_v61 = vadd.f32 %v2031_v50, %v1426_v9  ;;  %v1920_v11 = vpop.f32.mrb[32].mxu0  ;;  %v1564_v13 = vmax.f32 %v1520_v7, 0.0 }
 0x3c6   :  { %v1921_v8 = vpop.f32.mrb[33].mxu0 }
 0x3c7   :  { %v1565_v52 = vmax.f32 %v1523_v61, 0.0  ;;  %v1922_v14 = vadd.f32 %v1921_v8, %v1920_v11  ;;  %v1923_v15 = vpop.f32.mrb[34].mxu0  ;;  %v1855_v11 = vld [vmem:[%s2811_s7] ss:$0 sm:$0xff] }
 0x3c8   :  { %v1924_v16 = vpop.f32.mrb[35].mxu0  ;;  %v2034_v49 = vpop.f32.mrb[40].mxu1 }
 0x3c9   :  { %v1925_v18 = vadd.f32 %v1924_v16, %v1923_v15  ;;  %v1431_v20 = vadd.f32 %v1922_v14, %v2719_v17  ;;  %v1527_v21 = vpop.f32.mrb[41].mxu1  ;;  %v1577_v22 = vpack.c.bf16 %v1565_v52, %v1564_v13 }
 0x3ca   :  { %v2035_v24 = vpop.f32.mrb[42].mxu1 }
 0x3cb   :  { %v1528_v45 = vadd.f32 %v1527_v21, %v1431_v20  ;;  %v1434_v25 = vadd.f32 %v1925_v18, %v2719_v17  ;;  %v1530_v62 = vpop.f32.mrb[43].mxu1  ;;  %2061 = vmatmul.mubr.bf16.gmra.mrb[52].mxu0 %v1577_v22 }
 0x3cd   :  { %v1531_v55 = vadd.f32 %v1530_v62, %v1434_v25  ;;  %v1926_v26 = vpop.f32.mrb[36].mxu0  ;;  %v1566_v23 = vmax.f32 %v1528_v45, 0.0 }
 0x3ce   :  { %v1927_v27 = vpop.f32.mrb[37].mxu0 }
 0x3cf   :  { %v1567_v41 = vmax.f32 %v1531_v55, 0.0  ;;  %v1928_v28 = vadd.f32 %v1927_v27, %v1926_v26  ;;  %v1929_v57 = vpop.f32.mrb[38].mxu0 }
 0x3d0   :  { %v1930_v29 = vpop.f32.mrb[39].mxu0 }
 0x3d1   :  { %v1578_v19 = vpack.c.bf16 %v1567_v41, %v1566_v23  ;;  %v1439_v30 = vadd.f32 %v1928_v28, %v2719_v17  ;;  %v1931_v32 = vadd.f32 %v1930_v29, %v1929_v57 }
 0x3d3   :  { %v1536_v5 = vadd.f32 %v2034_v49, %v1439_v30  ;;  %v1442_v10 = vadd.f32 %v1931_v32, %v2719_v17  ;;  %2064 = vmatprep.mubr.bf16.mxu0 %v1578_v19 }
 0x3d5   :  { %v1539_v40 = vadd.f32 %v2035_v24, %v1442_v10  ;;  %v1932_v12 = vpop.f32.mrb[40].mxu0  ;;  %v1568_v31 = vmax.f32 %v1536_v5, 0.0 }
 0x3d6   :  { %v1933_v34 = vpop.f32.mrb[41].mxu0 }
 0x3d7   :  { %v1569_v53 = vmax.f32 %v1539_v40, 0.0  ;;  %v1934_v35 = vadd.f32 %v1933_v34, %v1932_v12  ;;  %v1935_v36 = vpop.f32.mrb[42].mxu0 }
 0x3d8   :  { %v1936_v37 = vpop.f32.mrb[43].mxu0  ;;  %v2038_v38 = vpop.f32.mrb[44].mxu1 }
 0x3d9   :  { %v1937_v42 = vadd.f32 %v1936_v37, %v1935_v36  ;;  %v1447_v39 = vadd.f32 %v1934_v35, %v2719_v17  ;;  %v1543_v44 = vpop.f32.mrb[45].mxu1  ;;  %v1579_v46 = vpack.c.bf16 %v1569_v53, %v1568_v31 }
 0x3da   :  { %v2039_v47 = vpop.f32.mrb[46].mxu1 }
 0x3db   :  { %v1544_v54 = vadd.f32 %v1543_v44, %v1447_v39  ;;  %v1450_v48 = vadd.f32 %v1937_v42, %v2719_v17  ;;  %v1546_v50 = vpop.f32.mrb[47].mxu1  ;;  %2065 = vmatmul.mubr.bf16.gmra.mrb[56].mxu0 %v1579_v46 }
 0x3dd   :  { %v1547_v51 = vadd.f32 %v1546_v50, %v1450_v48  ;;  %v1938_v43 = vpop.f32.mrb[44].mxu0  ;;  %v1570_v58 = vmax.f32 %v1544_v54, 0.0 }
 0x3de   :  { %v1939_v56 = vpop.f32.mrb[45].mxu0 }
 0x3df   :  { %v1571_v59 = vmax.f32 %v1547_v51, 0.0  ;;  %v1940_v60 = vadd.f32 %v1939_v56, %v1938_v43  ;;  %v1941_v63 = vpop.f32.mrb[46].mxu0 }
 0x3e0   :  { %v1942_v33 = vpop.f32.mrb[47].mxu0 }
 0x3e1   :  { %v1580_v3 = vpack.c.bf16 %v1571_v59, %v1570_v58  ;;  %v1455_v1 = vadd.f32 %v1940_v60, %v2719_v17  ;;  %v1943_v2 = vadd.f32 %v1942_v33, %v1941_v63 }
 0x3e3   :  { %v1552_v0 = vadd.f32 %v2038_v38, %v1455_v1  ;;  %v1458_v4 = vadd.f32 %v1943_v2, %v2719_v17  ;;  %2068 = vmatprep.mubr.bf16.mxu1 %v1580_v3 }
 0x3e5   :  { %v1555_v6 = vadd.f32 %v2039_v47, %v1458_v4  ;;  %v1572_v7 = vmax.f32 %v1552_v0, 0.0 }
 0x3e7   :  { %v1573_v9 = vmax.f32 %v1555_v6, 0.0 }
 0x3e9   :  { %v1581_v61 = vpack.c.bf16 %v1573_v9, %v1572_v7 }
 0x3eb   :  { %2069 = vmatmul.mubr.bf16.vlgmr.msra.gmra.mrb[48].mxu1 %v1581_v61 }
 0x48e   :  { %v2058_v8 = vpop.f32.mrb[48].mxu0 }
 0x48f   :  { %v1696_v13 = vadd.f32 %v2058_v8, %v1855_v11  ;;  %v1687_v52 = vpop.f32.mrb[49].mxu0 }
 0x490   :  { %v1688_v14 = vadd.f32 %v1855_v11, %v1687_v52  ;;  %v2059_v15 = vpop.f32.mrb[50].mxu0 }
 0x491   :  { %1753 = vst.msk [vmem:[%s2812_s8 + $0x10] sm:$0xff] %vm1750_vm2, %v1696_v13  ;;  %v1699_v17 = vadd.f32 %v2059_v15, %v1855_v11  ;;  %v1690_v16 = vpop.f32.mrb[51].mxu0 }
 0x492   :  { %1751 = vst.msk [vmem:[%s2812_s8] sm:$0xff] %vm1750_vm2, %v1688_v14  ;;  %v1691_v49 = vadd.f32 %v1855_v11, %v1690_v16 }
 0x493   :  { %1754 = vst.msk [vmem:[%s2812_s8 + $0x18] sm:$0xff] %vm1750_vm2, %v1699_v17 }
 0x494   :  { %1752 = vst.msk [vmem:[%s2812_s8 + $0x8] sm:$0xff] %vm1750_vm2, %v1691_v49 }
 0x49e   :  { %v2062_v18 = vpop.f32.mrb[52].mxu0 }
 0x49f   :  { %v1712_v20 = vadd.f32 %v2062_v18, %v1855_v11  ;;  %v1703_v21 = vpop.f32.mrb[53].mxu0 }
 0x4a0   :  { %v1704_v22 = vadd.f32 %v1855_v11, %v1703_v21  ;;  %v2063_v24 = vpop.f32.mrb[54].mxu0 }
 0x4a1   :  { %1757 = vst.msk [vmem:[%s2812_s8 + $0x30] sm:$0xff] %vm1750_vm2, %v1712_v20  ;;  %v1715_v45 = vadd.f32 %v2063_v24, %v1855_v11  ;;  %v1706_v25 = vpop.f32.mrb[55].mxu0 }
 0x4a2   :  { %1755 = vst.msk [vmem:[%s2812_s8 + $0x20] sm:$0xff] %vm1750_vm2, %v1704_v22  ;;  %v1707_v62 = vadd.f32 %v1855_v11, %v1706_v25 }
 0x4a3   :  { %1758 = vst.msk [vmem:[%s2812_s8 + $0x38] sm:$0xff] %vm1750_vm2, %v1715_v45 }
 0x4a4   :  { %1756 = vst.msk [vmem:[%s2812_s8 + $0x28] sm:$0xff] %vm1750_vm2, %v1707_v62 }
 0x4ae   :  { %v2066_v55 = vpop.f32.mrb[56].mxu0 }
 0x4af   :  { %v1728_v26 = vadd.f32 %v2066_v55, %v1855_v11  ;;  %v1719_v27 = vpop.f32.mrb[57].mxu0 }
 0x4b0   :  { %v1720_v23 = vadd.f32 %v1855_v11, %v1719_v27  ;;  %v2067_v41 = vpop.f32.mrb[58].mxu0 }
 0x4b1   :  { %1761 = vst.msk [vmem:[%s2812_s8 + $0x50] sm:$0xff] %vm1750_vm2, %v1728_v26  ;;  %v1731_v28 = vadd.f32 %v2067_v41, %v1855_v11  ;;  %v1722_v57 = vpop.f32.mrb[59].mxu0 }
 0x4b2   :  { %1759 = vst.msk [vmem:[%s2812_s8 + $0x40] sm:$0xff] %vm1750_vm2, %v1720_v23  ;;  %v1723_v29 = vadd.f32 %v1855_v11, %v1722_v57 }
 0x4b3   :  { %1762 = vst.msk [vmem:[%s2812_s8 + $0x58] sm:$0xff] %vm1750_vm2, %v1731_v28 }
 0x4b4   :  { %1760 = vst.msk [vmem:[%s2812_s8 + $0x48] sm:$0xff] %vm1750_vm2, %v1723_v29 }
 0x4be   :  { %v2070_v19 = vpop.f32.mrb[48].mxu1 }
 0x4bf   :  { %v1744_v30 = vadd.f32 %v2070_v19, %v1855_v11  ;;  %v1735_v32 = vpop.f32.mrb[49].mxu1 }
 0x4c0   :  { %v1736_v5 = vadd.f32 %v1855_v11, %v1735_v32  ;;  %v2071_v10 = vpop.f32.mrb[50].mxu1 }
 0x4c1   :  { %1765 = vst.msk [vmem:[%s2812_s8 + $0x70] sm:$0xff] %vm1750_vm2, %v1744_v30  ;;  %v1747_v40 = vadd.f32 %v2071_v10, %v1855_v11  ;;  %v1738_v12 = vpop.f32.mrb[51].mxu1 }
 0x4c2   :  { %1763 = vst.msk [vmem:[%s2812_s8 + $0x60] sm:$0xff] %vm1750_vm2, %v1736_v5  ;;  %v1739_v34 = vadd.f32 %v1855_v11, %v1738_v12 }
 0x4c3   :  { %1766 = vst.msk [vmem:[%s2812_s8 + $0x78] sm:$0xff] %vm1750_vm2, %v1747_v40 }
 0x4c4   :  { %1764 = vst.msk [vmem:[%s2812_s8 + $0x68] sm:$0xff] %vm1750_vm2, %v1739_v34 }

</bundles_post_ra>
